<compile_context>
chip_gen: v6e
topology: v6e:2x2x1
jax: 0.10.0
libtpu: 0.0.40
codegen_flags: <defaults>
</compile_context>

<pallas_src>
import functools

import jax
import jax.numpy as jnp
from jax.experimental import pallas as pl
from jax.experimental.pallas import tpu as pltpu


# ------------------------------ fused kernel -------------------------------- #

def _fused_joint_attn_kernel(x_ref, wqkv_ref, bqkv_ref, wp_ref, bp_ref, o_ref, qkv_scr,
                             *, num_joints, cpj, scale):
    j = num_joints
    h_ch = j * cpj
    tt = x_ref.shape[-1]                                      # tokens in this slab

    x = x_ref[...].astype(jnp.float32)                        # (C_in, tt), tokens on lanes

    # --- QKV 1x1 conv == (3H, C_in) @ (C_in, tt) on the MXU; stash in VMEM scratch ---
    qkv = jnp.dot(wqkv_ref[...].astype(jnp.float32), x,
                  preferred_element_type=jnp.float32)
    qkv_scr[...] = qkv + bqkv_ref[...].astype(jnp.float32)    # (3H, tt) + (3H, 1)

    # Row layout of qkv_scr (see prepare_params): part*H + c*J + joint
    #   row (c*J + a)        = Q[joint a, channel c]   (token index on the lane axis)
    #   row (H + c*J + b)    = K[joint b, channel c]
    #   row (2H + c*J + a)   = V[joint a, channel c]
    k_blocks = [qkv_scr[h_ch + c * j: h_ch + (c + 1) * j, :] for c in range(cpj)]  # (J, tt)
    h_blocks = [jnp.zeros((j, tt), jnp.float32) for _ in range(cpj)]               # (J, tt)

    # --- per-token joint attention: all (J, tt) VPU broadcast-mul-add, tokens on lanes ---
    for a in range(j):                                        # query joint (unrolled)
        s_a = None                                            # scores vs. all key joints
        for c in range(cpj):
            q_ac = qkv_scr[c * j + a: c * j + a + 1, :]       # (1, tt) -> sublane broadcast
            term = k_blocks[c] * q_ac
            s_a = term if s_a is None else s_a + term
        s_a = s_a * scale
        # softmax over the key-joint (sublane) axis; tokens stay dense on lanes
        s_a = s_a - jnp.max(s_a, axis=0, keepdims=True)
        p_a = jnp.exp(s_a)
        denom = jnp.sum(p_a, axis=0, keepdims=True)           # (1, tt)
        p_a = p_a * pl.reciprocal(denom, approx=True)         # EUP reciprocal (free slot)
        # h[c][jo, n] += p_a[jo, n] * V[a, c](n)
        for c in range(cpj):
            r = 2 * h_ch + c * j + a
            v_ac = qkv_scr[r: r + 1, :]                       # (1, tt)
            h_blocks[c] = h_blocks[c] + p_a * v_ac

    h = jnp.concatenate(h_blocks, axis=0)                     # (H, tt), row = c*J + joint

    # --- proj_out 1x1 conv + residual ---
    out = jnp.dot(wp_ref[...].astype(jnp.float32), h,
                  preferred_element_type=jnp.float32)
    out = out + bp_ref[...].astype(jnp.float32)               # (C_in, tt) + (C_in, 1)
    o_ref[...] = (x + out).astype(o_ref.dtype)


# ------------------------------ JAX wrappers -------------------------------- #

def prepare_params(params, *, num_joints):
    """Repack PyTorch Conv1d(k=1) weights into the kernel layout. Call once (not per step).

    params: wq/wk/wv (H, C_in), bq/bk/bv (H,), wp (C_in, H), bp (C_in,).
    """
    h_ch, _ = params["wq"].shape
    assert h_ch % num_joints == 0
    cpj = h_ch // num_joints
    # perm[c*J + joint] = joint*cpj + c : rows become channel-major / joint-minor so each
    # "all joints at channel c" group is one contiguous (J, tile_T) slab inside the kernel.
    perm = jnp.arange(h_ch).reshape(num_joints, cpj).T.reshape(-1)
    wqkv = jnp.concatenate(
        [params["wq"][perm], params["wk"][perm], params["wv"][perm]], axis=0)
    bqkv = jnp.concatenate(
        [params["bq"][perm], params["bk"][perm], params["bv"][perm]], axis=0)
    return {
        "wqkv": wqkv.astype(jnp.float32),                     # (3H, C_in)
        "bqkv": bqkv.astype(jnp.float32)[:, None],            # (3H, 1)
        "wp": params["wp"][:, perm].astype(jnp.float32),      # (C_in, H), cols permuted
        "bp": params["bp"].astype(jnp.float32)[:, None],      # (C_in, 1)
    }


def _pick_tile_t(t):
    for cand in (512, 384, 256, 128):                         # lane-dense tiles first
        if t % cand == 0:
            return cand
    return t                                                  # fall back to the full T axis


def joint_attn_block(x, kparams, *, num_joints, tile_t=None):
    """Forward of JointAttnBlock (norm_type=None, use_pe=False).

    x: (B, C_in, T) in the PyTorch NCT layout.  kparams: output of prepare_params().
    """
    b, c_in, t = x.shape
    h3, c_in_w = kparams["wqkv"].shape
    assert c_in_w == c_in
    h_ch = h3 // 3
    assert h_ch % num_joints == 0
    cpj = h_ch // num_joints

    if tile_t is None:
        tile_t = _pick_tile_t(t)
    assert t % tile_t == 0
    grid = (b, t // tile_t)

    kernel = functools.partial(
        _fused_joint_attn_kernel,
        num_joints=num_joints, cpj=cpj, scale=float(cpj) ** -0.5)

    return pl.pallas_call(
        kernel,
        out_shape=jax.ShapeDtypeStruct((b, c_in, t), x.dtype),
        grid=grid,
        in_specs=[
            pl.BlockSpec((None, c_in, tile_t), lambda bi, ti: (bi, 0, ti)),  # x slab
            pl.BlockSpec((3 * h_ch, c_in), lambda bi, ti: (0, 0)),           # fused QKV weight
            pl.BlockSpec((3 * h_ch, 1), lambda bi, ti: (0, 0)),              # fused QKV bias
            pl.BlockSpec((c_in, h_ch), lambda bi, ti: (0, 0)),               # proj_out weight
            pl.BlockSpec((c_in, 1), lambda bi, ti: (0, 0)),                  # proj_out bias
        ],
        out_specs=pl.BlockSpec((None, c_in, tile_t), lambda bi, ti: (bi, 0, ti)),
        scratch_shapes=[pltpu.VMEM((3 * h_ch, tile_t), jnp.float32)],
        compiler_params=pltpu.CompilerParams(
            dimension_semantics=("parallel", "parallel"),     # megacore / v7x dual-TC
            vmem_limit_bytes=32 * 1024 * 1024,                # working set << 1 MiB/step
        ),
    )(x, kparams["wqkv"], kparams["bqkv"], kparams["wp"], kparams["bp"])


# --------------------------- pure-JAX reference ----------------------------- #

def reference(x, params, num_joints):
    b, c_in, t = x.shape
    h_ch = params["wq"].shape[0]
    j = num_joints
    cpj = h_ch // j

    def conv1x1(inp, w, bias):
        return jnp.einsum("oc,bct->bot", w, inp) + bias[None, :, None]

    q = conv1x1(x, params["wq"], params["bq"])
    k = conv1x1(x, params["wk"], params["bk"])
    v = conv1x1(x, params["wv"], params["bv"])

    def r_jc(a):  # 'b (j c) t -> (b t) j c'
        return jnp.transpose(a.reshape(b, j, cpj, t), (0, 3, 1, 2)).reshape(b * t, j, cpj)

    qm, km, vm = r_jc(q), r_jc(k), r_jc(v)
    w_ = jnp.einsum("njc,nmc->njm", qm, km) * (float(cpj) ** -0.5)
    w_ = jax.nn.softmax(w_, axis=-1)
    h_ = jnp.einsum("njm,njc->nmc", w_, vm)                 # (N, joint, c)
    h_ = jnp.transpose(h_.reshape(b, t, h_ch), (0, 2, 1))   # 'b (j c) t'
    out = conv1x1(h_, params["wp"], params["bp"])
    return x + out


# ---------------------------------- main ------------------------------------ #

if __name__ == "__main__":
    B, C_IN, T = 2, 16, 16          # batch, in_channels, sequence length
    HID, J = 32, 8                  # hidden_channels, num_joints (HID % J == 0)

    key = jax.random.PRNGKey(0)
    ks = jax.random.split(key, 9)
    params = {
        "wq": jax.random.normal(ks[0], (HID, C_IN), jnp.float32) * 0.1,
        "bq": jax.random.normal(ks[1], (HID,), jnp.float32) * 0.1,
        "wk": jax.random.normal(ks[2], (HID, C_IN), jnp.float32) * 0.1,
        "bk": jax.random.normal(ks[3], (HID,), jnp.float32) * 0.1,
        "wv": jax.random.normal(ks[4], (HID, C_IN), jnp.float32) * 0.1,
        "bv": jax.random.normal(ks[5], (HID,), jnp.float32) * 0.1,
        "wp": jax.random.normal(ks[6], (C_IN, HID), jnp.float32) * 0.1,
        "bp": jax.random.normal(ks[7], (C_IN,), jnp.float32) * 0.1,
    }
    x = jax.random.normal(ks[8], (B, C_IN, T), jnp.float32)

    kparams = prepare_params(params, num_joints=J)            # one-time weight repack
    out = joint_attn_block(x, kparams, num_joints=J)
    out = jax.block_until_ready(out)

    ref = reference(x, params, J)
    assert out.shape == (B, C_IN, T)
    # Tolerance slightly loosened because the softmax uses the EUP approximate reciprocal.
    assert jnp.allclose(out, ref, atol=2e-3, rtol=2e-3), (
        f"max abs err {jnp.max(jnp.abs(out - ref))}"
    )
    print("KERNEL_OK")
</pallas_src>

<mosaic_0001>
module attributes {stable_mosaic.version = 11 : i64} {
  func.func @_fused_joint_attn_kernel(%arg0: i32, %arg1: i32, %arg2: memref<1x16x16xf32, #tpu.memory_space<vmem>>, %arg3: memref<96x16xf32, #tpu.memory_space<vmem>>, %arg4: memref<96x1xf32, #tpu.memory_space<vmem>>, %arg5: memref<16x32xf32, #tpu.memory_space<vmem>>, %arg6: memref<16x1xf32, #tpu.memory_space<vmem>>, %arg7: memref<1x16x16xf32, #tpu.memory_space<vmem>>, %arg8: memref<96x16xf32, #tpu.memory_space<vmem>>) attributes {dimension_semantics = [#tpu.dimension_semantics<parallel>, #tpu.dimension_semantics<parallel>], iteration_bounds = array<i64: 2, 1>, scalar_prefetch = 0 : i64, scratch_operands = 1 : i64, tpu.core_type = #tpu.core_type<tc>, window_params = [{transform_indices = @transform_0, window_bounds = array<i64: 1, 16, 16>}, {pipeline_mode = #tpu.pipeline_mode<synchronous>, transform_indices = @transform_1, window_bounds = array<i64: 96, 16>}, {pipeline_mode = #tpu.pipeline_mode<synchronous>, transform_indices = @transform_2, window_bounds = array<i64: 96, 1>}, {pipeline_mode = #tpu.pipeline_mode<synchronous>, transform_indices = @transform_3, window_bounds = array<i64: 16, 32>}, {pipeline_mode = #tpu.pipeline_mode<synchronous>, transform_indices = @transform_4, window_bounds = array<i64: 16, 1>}, {transform_indices = @transform_5, window_bounds = array<i64: 1, 16, 16>}]} {
    %c0 = arith.constant 0 : index
    %c0_0 = arith.constant 0 : index
    %c0_1 = arith.constant 0 : index
    %0 = vector.load %arg2[%c0, %c0_0, %c0_1] : memref<1x16x16xf32, #tpu.memory_space<vmem>>, vector<1x16x16xf32>
    %1 = vector.shape_cast %0 : vector<1x16x16xf32> to vector<16x16xf32>
    %c0_2 = arith.constant 0 : index
    %c0_3 = arith.constant 0 : index
    %2 = vector.load %arg3[%c0_2, %c0_3] : memref<96x16xf32, #tpu.memory_space<vmem>>, vector<96x16xf32>
    %cst = arith.constant dense<0.000000e+00> : vector<96x16xf32>
    %3 = tpu.matmul %2, %1, %cst {dimension_numbers = #tpu.dot_dimension_numbers<[1], [0], [0], [1], [0, 0, 1, 1], [], []>} : vector<96x16xf32>, vector<16x16xf32>, vector<96x16xf32> -> vector<96x16xf32>
    %c0_4 = arith.constant 0 : index
    %c0_5 = arith.constant 0 : index
    %4 = vector.load %arg4[%c0_4, %c0_5] : memref<96x1xf32, #tpu.memory_space<vmem>>, vector<96x1xf32>
    %5 = vector.broadcast %4 : vector<96x1xf32> to vector<96x16xf32>
    %6 = arith.addf %3, %5 : vector<96x16xf32>
    %c0_6 = arith.constant 0 : index
    %c0_7 = arith.constant 0 : index
    %7 = vector.load %arg8[%c0_6, %c0_7] : memref<96x16xf32, #tpu.memory_space<vmem>>, vector<96x16xf32>
    tpu.vector_store %arg8[%c0_6, %c0_7], %6 {strides = array<i32>} : memref<96x16xf32, #tpu.memory_space<vmem>>, vector<96x16xf32>,
    %c32 = arith.constant 32 : index
    %c0_8 = arith.constant 0 : index
    %8 = vector.load %arg8[%c32, %c0_8] : memref<96x16xf32, #tpu.memory_space<vmem>>, vector<8x16xf32>
    %c40 = arith.constant 40 : index
    %c0_9 = arith.constant 0 : index
    %9 = vector.load %arg8[%c40, %c0_9] : memref<96x16xf32, #tpu.memory_space<vmem>>, vector<8x16xf32>
    %c48 = arith.constant 48 : index
    %c0_10 = arith.constant 0 : index
    %10 = vector.load %arg8[%c48, %c0_10] : memref<96x16xf32, #tpu.memory_space<vmem>>, vector<8x16xf32>
    %c56 = arith.constant 56 : index
    %c0_11 = arith.constant 0 : index
    %11 = vector.load %arg8[%c56, %c0_11] : memref<96x16xf32, #tpu.memory_space<vmem>>, vector<8x16xf32>
    %cst_12 = arith.constant 0.000000e+00 : f32
    %12 = vector.broadcast %cst_12 : f32 to vector<8x16xf32>
    %cst_13 = arith.constant 0.000000e+00 : f32
    %13 = vector.broadcast %cst_13 : f32 to vector<8x16xf32>
    %cst_14 = arith.constant 0.000000e+00 : f32
    %14 = vector.broadcast %cst_14 : f32 to vector<8x16xf32>
    %cst_15 = arith.constant 0.000000e+00 : f32
    %15 = vector.broadcast %cst_15 : f32 to vector<8x16xf32>
    %c0_16 = arith.constant 0 : index
    %c0_17 = arith.constant 0 : index
    %16 = vector.load %arg8[%c0_16, %c0_17] : memref<96x16xf32, #tpu.memory_space<vmem>>, vector<1x16xf32>
    %17 = vector.broadcast %16 : vector<1x16xf32> to vector<8x16xf32>
    %18 = arith.mulf %8, %17 : vector<8x16xf32>
    %c8 = arith.constant 8 : index
    %c0_18 = arith.constant 0 : index
    %19 = vector.load %arg8[%c8, %c0_18] : memref<96x16xf32, #tpu.memory_space<vmem>>, vector<1x16xf32>
    %20 = vector.broadcast %19 : vector<1x16xf32> to vector<8x16xf32>
    %21 = arith.mulf %9, %20 : vector<8x16xf32>
    %22 = arith.addf %18, %21 : vector<8x16xf32>
    %c16 = arith.constant 16 : index
    %c0_19 = arith.constant 0 : index
    %23 = vector.load %arg8[%c16, %c0_19] : memref<96x16xf32, #tpu.memory_space<vmem>>, vector<1x16xf32>
    %24 = vector.broadcast %23 : vector<1x16xf32> to vector<8x16xf32>
    %25 = arith.mulf %10, %24 : vector<8x16xf32>
    %26 = arith.addf %22, %25 : vector<8x16xf32>
    %c24 = arith.constant 24 : index
    %c0_20 = arith.constant 0 : index
    %27 = vector.load %arg8[%c24, %c0_20] : memref<96x16xf32, #tpu.memory_space<vmem>>, vector<1x16xf32>
    %28 = vector.broadcast %27 : vector<1x16xf32> to vector<8x16xf32>
    %29 = arith.mulf %11, %28 : vector<8x16xf32>
    %30 = arith.addf %26, %29 : vector<8x16xf32>
    %cst_21 = arith.constant 5.000000e-01 : f32
    %31 = vector.broadcast %cst_21 : f32 to vector<8x16xf32>
    %32 = arith.mulf %30, %31 : vector<8x16xf32>
    %cst_22 = arith.constant dense<0xFF800000> : vector<16xf32>
    %33 = vector.multi_reduction <maximumf>, %32, %cst_22 [0] : vector<8x16xf32> to vector<16xf32>
    %34 = vector.shape_cast %33 : vector<16xf32> to vector<1x16xf32>
    %35 = vector.broadcast %34 : vector<1x16xf32> to vector<8x16xf32>
    %36 = arith.subf %32, %35 : vector<8x16xf32>
    %37 = math.exp %36 : vector<8x16xf32>
    %cst_23 = arith.constant dense<0.000000e+00> : vector<16xf32>
    %38 = vector.multi_reduction <add>, %37, %cst_23 [0] : vector<8x16xf32> to vector<16xf32>
    %39 = vector.shape_cast %38 : vector<16xf32> to vector<1x16xf32>
    %40 = tpu.reciprocal %39 {approx = true} : vector<1x16xf32> -> vector<1x16xf32>
    %41 = vector.broadcast %40 : vector<1x16xf32> to vector<8x16xf32>
    %42 = arith.mulf %37, %41 : vector<8x16xf32>
    %c64 = arith.constant 64 : index
    %c0_24 = arith.constant 0 : index
    %43 = vector.load %arg8[%c64, %c0_24] : memref<96x16xf32, #tpu.memory_space<vmem>>, vector<1x16xf32>
    %44 = vector.broadcast %43 : vector<1x16xf32> to vector<8x16xf32>
    %45 = arith.mulf %42, %44 : vector<8x16xf32>
    %46 = arith.addf %12, %45 : vector<8x16xf32>
    %c72 = arith.constant 72 : index
    %c0_25 = arith.constant 0 : index
    %47 = vector.load %arg8[%c72, %c0_25] : memref<96x16xf32, #tpu.memory_space<vmem>>, vector<1x16xf32>
    %48 = vector.broadcast %47 : vector<1x16xf32> to vector<8x16xf32>
    %49 = arith.mulf %42, %48 : vector<8x16xf32>
    %50 = arith.addf %13, %49 : vector<8x16xf32>
    %c80 = arith.constant 80 : index
    %c0_26 = arith.constant 0 : index
    %51 = vector.load %arg8[%c80, %c0_26] : memref<96x16xf32, #tpu.memory_space<vmem>>, vector<1x16xf32>
    %52 = vector.broadcast %51 : vector<1x16xf32> to vector<8x16xf32>
    %53 = arith.mulf %42, %52 : vector<8x16xf32>
    %54 = arith.addf %14, %53 : vector<8x16xf32>
    %c88 = arith.constant 88 : index
    %c0_27 = arith.constant 0 : index
    %55 = vector.load %arg8[%c88, %c0_27] : memref<96x16xf32, #tpu.memory_space<vmem>>, vector<1x16xf32>
    %56 = vector.broadcast %55 : vector<1x16xf32> to vector<8x16xf32>
    %57 = arith.mulf %42, %56 : vector<8x16xf32>
    %58 = arith.addf %15, %57 : vector<8x16xf32>
    %c1 = arith.constant 1 : index
    %c0_28 = arith.constant 0 : index
    %59 = vector.load %arg8[%c1, %c0_28] : memref<96x16xf32, #tpu.memory_space<vmem>>, vector<1x16xf32>
    %60 = vector.broadcast %59 : vector<1x16xf32> to vector<8x16xf32>
    %61 = arith.mulf %8, %60 : vector<8x16xf32>
    %c9 = arith.constant 9 : index
    %c0_29 = arith.constant 0 : index
    %62 = vector.load %arg8[%c9, %c0_29] : memref<96x16xf32, #tpu.memory_space<vmem>>, vector<1x16xf32>
    %63 = vector.broadcast %62 : vector<1x16xf32> to vector<8x16xf32>
    %64 = arith.mulf %9, %63 : vector<8x16xf32>
    %65 = arith.addf %61, %64 : vector<8x16xf32>
    %c17 = arith.constant 17 : index
    %c0_30 = arith.constant 0 : index
    %66 = vector.load %arg8[%c17, %c0_30] : memref<96x16xf32, #tpu.memory_space<vmem>>, vector<1x16xf32>
    %67 = vector.broadcast %66 : vector<1x16xf32> to vector<8x16xf32>
    %68 = arith.mulf %10, %67 : vector<8x16xf32>
    %69 = arith.addf %65, %68 : vector<8x16xf32>
    %c25 = arith.constant 25 : index
    %c0_31 = arith.constant 0 : index
    %70 = vector.load %arg8[%c25, %c0_31] : memref<96x16xf32, #tpu.memory_space<vmem>>, vector<1x16xf32>
    %71 = vector.broadcast %70 : vector<1x16xf32> to vector<8x16xf32>
    %72 = arith.mulf %11, %71 : vector<8x16xf32>
    %73 = arith.addf %69, %72 : vector<8x16xf32>
    %cst_32 = arith.constant 5.000000e-01 : f32
    %74 = vector.broadcast %cst_32 : f32 to vector<8x16xf32>
    %75 = arith.mulf %73, %74 : vector<8x16xf32>
    %cst_33 = arith.constant dense<0xFF800000> : vector<16xf32>
    %76 = vector.multi_reduction <maximumf>, %75, %cst_33 [0] : vector<8x16xf32> to vector<16xf32>
    %77 = vector.shape_cast %76 : vector<16xf32> to vector<1x16xf32>
    %78 = vector.broadcast %77 : vector<1x16xf32> to vector<8x16xf32>
    %79 = arith.subf %75, %78 : vector<8x16xf32>
    %80 = math.exp %79 : vector<8x16xf32>
    %cst_34 = arith.constant dense<0.000000e+00> : vector<16xf32>
    %81 = vector.multi_reduction <add>, %80, %cst_34 [0] : vector<8x16xf32> to vector<16xf32>
    %82 = vector.shape_cast %81 : vector<16xf32> to vector<1x16xf32>
    %83 = tpu.reciprocal %82 {approx = true} : vector<1x16xf32> -> vector<1x16xf32>
    %84 = vector.broadcast %83 : vector<1x16xf32> to vector<8x16xf32>
    %85 = arith.mulf %80, %84 : vector<8x16xf32>
    %c65 = arith.constant 65 : index
    %c0_35 = arith.constant 0 : index
    %86 = vector.load %arg8[%c65, %c0_35] : memref<96x16xf32, #tpu.memory_space<vmem>>, vector<1x16xf32>
    %87 = vector.broadcast %86 : vector<1x16xf32> to vector<8x16xf32>
    %88 = arith.mulf %85, %87 : vector<8x16xf32>
    %89 = arith.addf %46, %88 : vector<8x16xf32>
    %c73 = arith.constant 73 : index
    %c0_36 = arith.constant 0 : index
    %90 = vector.load %arg8[%c73, %c0_36] : memref<96x16xf32, #tpu.memory_space<vmem>>, vector<1x16xf32>
    %91 = vector.broadcast %90 : vector<1x16xf32> to vector<8x16xf32>
    %92 = arith.mulf %85, %91 : vector<8x16xf32>
    %93 = arith.addf %50, %92 : vector<8x16xf32>
    %c81 = arith.constant 81 : index
    %c0_37 = arith.constant 0 : index
    %94 = vector.load %arg8[%c81, %c0_37] : memref<96x16xf32, #tpu.memory_space<vmem>>, vector<1x16xf32>
    %95 = vector.broadcast %94 : vector<1x16xf32> to vector<8x16xf32>
    %96 = arith.mulf %85, %95 : vector<8x16xf32>
    %97 = arith.addf %54, %96 : vector<8x16xf32>
    %c89 = arith.constant 89 : index
    %c0_38 = arith.constant 0 : index
    %98 = vector.load %arg8[%c89, %c0_38] : memref<96x16xf32, #tpu.memory_space<vmem>>, vector<1x16xf32>
    %99 = vector.broadcast %98 : vector<1x16xf32> to vector<8x16xf32>
    %100 = arith.mulf %85, %99 : vector<8x16xf32>
    %101 = arith.addf %58, %100 : vector<8x16xf32>
    %c2 = arith.constant 2 : index
    %c0_39 = arith.constant 0 : index
    %102 = vector.load %arg8[%c2, %c0_39] : memref<96x16xf32, #tpu.memory_space<vmem>>, vector<1x16xf32>
    %103 = vector.broadcast %102 : vector<1x16xf32> to vector<8x16xf32>
    %104 = arith.mulf %8, %103 : vector<8x16xf32>
    %c10 = arith.constant 10 : index
    %c0_40 = arith.constant 0 : index
    %105 = vector.load %arg8[%c10, %c0_40] : memref<96x16xf32, #tpu.memory_space<vmem>>, vector<1x16xf32>
    %106 = vector.broadcast %105 : vector<1x16xf32> to vector<8x16xf32>
    %107 = arith.mulf %9, %106 : vector<8x16xf32>
    %108 = arith.addf %104, %107 : vector<8x16xf32>
    %c18 = arith.constant 18 : index
    %c0_41 = arith.constant 0 : index
    %109 = vector.load %arg8[%c18, %c0_41] : memref<96x16xf32, #tpu.memory_space<vmem>>, vector<1x16xf32>
    %110 = vector.broadcast %109 : vector<1x16xf32> to vector<8x16xf32>
    %111 = arith.mulf %10, %110 : vector<8x16xf32>
    %112 = arith.addf %108, %111 : vector<8x16xf32>
    %c26 = arith.constant 26 : index
    %c0_42 = arith.constant 0 : index
    %113 = vector.load %arg8[%c26, %c0_42] : memref<96x16xf32, #tpu.memory_space<vmem>>, vector<1x16xf32>
    %114 = vector.broadcast %113 : vector<1x16xf32> to vector<8x16xf32>
    %115 = arith.mulf %11, %114 : vector<8x16xf32>
    %116 = arith.addf %112, %115 : vector<8x16xf32>
    %cst_43 = arith.constant 5.000000e-01 : f32
    %117 = vector.broadcast %cst_43 : f32 to vector<8x16xf32>
    %118 = arith.mulf %116, %117 : vector<8x16xf32>
    %cst_44 = arith.constant dense<0xFF800000> : vector<16xf32>
    %119 = vector.multi_reduction <maximumf>, %118, %cst_44 [0] : vector<8x16xf32> to vector<16xf32>
    %120 = vector.shape_cast %119 : vector<16xf32> to vector<1x16xf32>
    %121 = vector.broadcast %120 : vector<1x16xf32> to vector<8x16xf32>
    %122 = arith.subf %118, %121 : vector<8x16xf32>
    %123 = math.exp %122 : vector<8x16xf32>
    %cst_45 = arith.constant dense<0.000000e+00> : vector<16xf32>
    %124 = vector.multi_reduction <add>, %123, %cst_45 [0] : vector<8x16xf32> to vector<16xf32>
    %125 = vector.shape_cast %124 : vector<16xf32> to vector<1x16xf32>
    %126 = tpu.reciprocal %125 {approx = true} : vector<1x16xf32> -> vector<1x16xf32>
    %127 = vector.broadcast %126 : vector<1x16xf32> to vector<8x16xf32>
    %128 = arith.mulf %123, %127 : vector<8x16xf32>
    %c66 = arith.constant 66 : index
    %c0_46 = arith.constant 0 : index
    %129 = vector.load %arg8[%c66, %c0_46] : memref<96x16xf32, #tpu.memory_space<vmem>>, vector<1x16xf32>
    %130 = vector.broadcast %129 : vector<1x16xf32> to vector<8x16xf32>
    %131 = arith.mulf %128, %130 : vector<8x16xf32>
    %132 = arith.addf %89, %131 : vector<8x16xf32>
    %c74 = arith.constant 74 : index
    %c0_47 = arith.constant 0 : index
    %133 = vector.load %arg8[%c74, %c0_47] : memref<96x16xf32, #tpu.memory_space<vmem>>, vector<1x16xf32>
    %134 = vector.broadcast %133 : vector<1x16xf32> to vector<8x16xf32>
    %135 = arith.mulf %128, %134 : vector<8x16xf32>
    %136 = arith.addf %93, %135 : vector<8x16xf32>
    %c82 = arith.constant 82 : index
    %c0_48 = arith.constant 0 : index
    %137 = vector.load %arg8[%c82, %c0_48] : memref<96x16xf32, #tpu.memory_space<vmem>>, vector<1x16xf32>
    %138 = vector.broadcast %137 : vector<1x16xf32> to vector<8x16xf32>
    %139 = arith.mulf %128, %138 : vector<8x16xf32>
    %140 = arith.addf %97, %139 : vector<8x16xf32>
    %c90 = arith.constant 90 : index
    %c0_49 = arith.constant 0 : index
    %141 = vector.load %arg8[%c90, %c0_49] : memref<96x16xf32, #tpu.memory_space<vmem>>, vector<1x16xf32>
    %142 = vector.broadcast %141 : vector<1x16xf32> to vector<8x16xf32>
    %143 = arith.mulf %128, %142 : vector<8x16xf32>
    %144 = arith.addf %101, %143 : vector<8x16xf32>
    %c3 = arith.constant 3 : index
    %c0_50 = arith.constant 0 : index
    %145 = vector.load %arg8[%c3, %c0_50] : memref<96x16xf32, #tpu.memory_space<vmem>>, vector<1x16xf32>
    %146 = vector.broadcast %145 : vector<1x16xf32> to vector<8x16xf32>
    %147 = arith.mulf %8, %146 : vector<8x16xf32>
    %c11 = arith.constant 11 : index
    %c0_51 = arith.constant 0 : index
    %148 = vector.load %arg8[%c11, %c0_51] : memref<96x16xf32, #tpu.memory_space<vmem>>, vector<1x16xf32>
    %149 = vector.broadcast %148 : vector<1x16xf32> to vector<8x16xf32>
    %150 = arith.mulf %9, %149 : vector<8x16xf32>
    %151 = arith.addf %147, %150 : vector<8x16xf32>
    %c19 = arith.constant 19 : index
    %c0_52 = arith.constant 0 : index
    %152 = vector.load %arg8[%c19, %c0_52] : memref<96x16xf32, #tpu.memory_space<vmem>>, vector<1x16xf32>
    %153 = vector.broadcast %152 : vector<1x16xf32> to vector<8x16xf32>
    %154 = arith.mulf %10, %153 : vector<8x16xf32>
    %155 = arith.addf %151, %154 : vector<8x16xf32>
    %c27 = arith.constant 27 : index
    %c0_53 = arith.constant 0 : index
    %156 = vector.load %arg8[%c27, %c0_53] : memref<96x16xf32, #tpu.memory_space<vmem>>, vector<1x16xf32>
    %157 = vector.broadcast %156 : vector<1x16xf32> to vector<8x16xf32>
    %158 = arith.mulf %11, %157 : vector<8x16xf32>
    %159 = arith.addf %155, %158 : vector<8x16xf32>
    %cst_54 = arith.constant 5.000000e-01 : f32
    %160 = vector.broadcast %cst_54 : f32 to vector<8x16xf32>
    %161 = arith.mulf %159, %160 : vector<8x16xf32>
    %cst_55 = arith.constant dense<0xFF800000> : vector<16xf32>
    %162 = vector.multi_reduction <maximumf>, %161, %cst_55 [0] : vector<8x16xf32> to vector<16xf32>
    %163 = vector.shape_cast %162 : vector<16xf32> to vector<1x16xf32>
    %164 = vector.broadcast %163 : vector<1x16xf32> to vector<8x16xf32>
    %165 = arith.subf %161, %164 : vector<8x16xf32>
    %166 = math.exp %165 : vector<8x16xf32>
    %cst_56 = arith.constant dense<0.000000e+00> : vector<16xf32>
    %167 = vector.multi_reduction <add>, %166, %cst_56 [0] : vector<8x16xf32> to vector<16xf32>
    %168 = vector.shape_cast %167 : vector<16xf32> to vector<1x16xf32>
    %169 = tpu.reciprocal %168 {approx = true} : vector<1x16xf32> -> vector<1x16xf32>
    %170 = vector.broadcast %169 : vector<1x16xf32> to vector<8x16xf32>
    %171 = arith.mulf %166, %170 : vector<8x16xf32>
    %c67 = arith.constant 67 : index
    %c0_57 = arith.constant 0 : index
    %172 = vector.load %arg8[%c67, %c0_57] : memref<96x16xf32, #tpu.memory_space<vmem>>, vector<1x16xf32>
    %173 = vector.broadcast %172 : vector<1x16xf32> to vector<8x16xf32>
    %174 = arith.mulf %171, %173 : vector<8x16xf32>
    %175 = arith.addf %132, %174 : vector<8x16xf32>
    %c75 = arith.constant 75 : index
    %c0_58 = arith.constant 0 : index
    %176 = vector.load %arg8[%c75, %c0_58] : memref<96x16xf32, #tpu.memory_space<vmem>>, vector<1x16xf32>
    %177 = vector.broadcast %176 : vector<1x16xf32> to vector<8x16xf32>
    %178 = arith.mulf %171, %177 : vector<8x16xf32>
    %179 = arith.addf %136, %178 : vector<8x16xf32>
    %c83 = arith.constant 83 : index
    %c0_59 = arith.constant 0 : index
    %180 = vector.load %arg8[%c83, %c0_59] : memref<96x16xf32, #tpu.memory_space<vmem>>, vector<1x16xf32>
    %181 = vector.broadcast %180 : vector<1x16xf32> to vector<8x16xf32>
    %182 = arith.mulf %171, %181 : vector<8x16xf32>
    %183 = arith.addf %140, %182 : vector<8x16xf32>
    %c91 = arith.constant 91 : index
    %c0_60 = arith.constant 0 : index
    %184 = vector.load %arg8[%c91, %c0_60] : memref<96x16xf32, #tpu.memory_space<vmem>>, vector<1x16xf32>
    %185 = vector.broadcast %184 : vector<1x16xf32> to vector<8x16xf32>
    %186 = arith.mulf %171, %185 : vector<8x16xf32>
    %187 = arith.addf %144, %186 : vector<8x16xf32>
    %c4 = arith.constant 4 : index
    %c0_61 = arith.constant 0 : index
    %188 = vector.load %arg8[%c4, %c0_61] : memref<96x16xf32, #tpu.memory_space<vmem>>, vector<1x16xf32>
    %189 = vector.broadcast %188 : vector<1x16xf32> to vector<8x16xf32>
    %190 = arith.mulf %8, %189 : vector<8x16xf32>
    %c12 = arith.constant 12 : index
    %c0_62 = arith.constant 0 : index
    %191 = vector.load %arg8[%c12, %c0_62] : memref<96x16xf32, #tpu.memory_space<vmem>>, vector<1x16xf32>
    %192 = vector.broadcast %191 : vector<1x16xf32> to vector<8x16xf32>
    %193 = arith.mulf %9, %192 : vector<8x16xf32>
    %194 = arith.addf %190, %193 : vector<8x16xf32>
    %c20 = arith.constant 20 : index
    %c0_63 = arith.constant 0 : index
    %195 = vector.load %arg8[%c20, %c0_63] : memref<96x16xf32, #tpu.memory_space<vmem>>, vector<1x16xf32>
    %196 = vector.broadcast %195 : vector<1x16xf32> to vector<8x16xf32>
    %197 = arith.mulf %10, %196 : vector<8x16xf32>
    %198 = arith.addf %194, %197 : vector<8x16xf32>
    %c28 = arith.constant 28 : index
    %c0_64 = arith.constant 0 : index
    %199 = vector.load %arg8[%c28, %c0_64] : memref<96x16xf32, #tpu.memory_space<vmem>>, vector<1x16xf32>
    %200 = vector.broadcast %199 : vector<1x16xf32> to vector<8x16xf32>
    %201 = arith.mulf %11, %200 : vector<8x16xf32>
    %202 = arith.addf %198, %201 : vector<8x16xf32>
    %cst_65 = arith.constant 5.000000e-01 : f32
    %203 = vector.broadcast %cst_65 : f32 to vector<8x16xf32>
    %204 = arith.mulf %202, %203 : vector<8x16xf32>
    %cst_66 = arith.constant dense<0xFF800000> : vector<16xf32>
    %205 = vector.multi_reduction <maximumf>, %204, %cst_66 [0] : vector<8x16xf32> to vector<16xf32>
    %206 = vector.shape_cast %205 : vector<16xf32> to vector<1x16xf32>
    %207 = vector.broadcast %206 : vector<1x16xf32> to vector<8x16xf32>
    %208 = arith.subf %204, %207 : vector<8x16xf32>
    %209 = math.exp %208 : vector<8x16xf32>
    %cst_67 = arith.constant dense<0.000000e+00> : vector<16xf32>
    %210 = vector.multi_reduction <add>, %209, %cst_67 [0] : vector<8x16xf32> to vector<16xf32>
    %211 = vector.shape_cast %210 : vector<16xf32> to vector<1x16xf32>
    %212 = tpu.reciprocal %211 {approx = true} : vector<1x16xf32> -> vector<1x16xf32>
    %213 = vector.broadcast %212 : vector<1x16xf32> to vector<8x16xf32>
    %214 = arith.mulf %209, %213 : vector<8x16xf32>
    %c68 = arith.constant 68 : index
    %c0_68 = arith.constant 0 : index
    %215 = vector.load %arg8[%c68, %c0_68] : memref<96x16xf32, #tpu.memory_space<vmem>>, vector<1x16xf32>
    %216 = vector.broadcast %215 : vector<1x16xf32> to vector<8x16xf32>
    %217 = arith.mulf %214, %216 : vector<8x16xf32>
    %218 = arith.addf %175, %217 : vector<8x16xf32>
    %c76 = arith.constant 76 : index
    %c0_69 = arith.constant 0 : index
    %219 = vector.load %arg8[%c76, %c0_69] : memref<96x16xf32, #tpu.memory_space<vmem>>, vector<1x16xf32>
    %220 = vector.broadcast %219 : vector<1x16xf32> to vector<8x16xf32>
    %221 = arith.mulf %214, %220 : vector<8x16xf32>
    %222 = arith.addf %179, %221 : vector<8x16xf32>
    %c84 = arith.constant 84 : index
    %c0_70 = arith.constant 0 : index
    %223 = vector.load %arg8[%c84, %c0_70] : memref<96x16xf32, #tpu.memory_space<vmem>>, vector<1x16xf32>
    %224 = vector.broadcast %223 : vector<1x16xf32> to vector<8x16xf32>
    %225 = arith.mulf %214, %224 : vector<8x16xf32>
    %226 = arith.addf %183, %225 : vector<8x16xf32>
    %c92 = arith.constant 92 : index
    %c0_71 = arith.constant 0 : index
    %227 = vector.load %arg8[%c92, %c0_71] : memref<96x16xf32, #tpu.memory_space<vmem>>, vector<1x16xf32>
    %228 = vector.broadcast %227 : vector<1x16xf32> to vector<8x16xf32>
    %229 = arith.mulf %214, %228 : vector<8x16xf32>
    %230 = arith.addf %187, %229 : vector<8x16xf32>
    %c5 = arith.constant 5 : index
    %c0_72 = arith.constant 0 : index
    %231 = vector.load %arg8[%c5, %c0_72] : memref<96x16xf32, #tpu.memory_space<vmem>>, vector<1x16xf32>
    %232 = vector.broadcast %231 : vector<1x16xf32> to vector<8x16xf32>
    %233 = arith.mulf %8, %232 : vector<8x16xf32>
    %c13 = arith.constant 13 : index
    %c0_73 = arith.constant 0 : index
    %234 = vector.load %arg8[%c13, %c0_73] : memref<96x16xf32, #tpu.memory_space<vmem>>, vector<1x16xf32>
    %235 = vector.broadcast %234 : vector<1x16xf32> to vector<8x16xf32>
    %236 = arith.mulf %9, %235 : vector<8x16xf32>
    %237 = arith.addf %233, %236 : vector<8x16xf32>
    %c21 = arith.constant 21 : index
    %c0_74 = arith.constant 0 : index
    %238 = vector.load %arg8[%c21, %c0_74] : memref<96x16xf32, #tpu.memory_space<vmem>>, vector<1x16xf32>
    %239 = vector.broadcast %238 : vector<1x16xf32> to vector<8x16xf32>
    %240 = arith.mulf %10, %239 : vector<8x16xf32>
    %241 = arith.addf %237, %240 : vector<8x16xf32>
    %c29 = arith.constant 29 : index
    %c0_75 = arith.constant 0 : index
    %242 = vector.load %arg8[%c29, %c0_75] : memref<96x16xf32, #tpu.memory_space<vmem>>, vector<1x16xf32>
    %243 = vector.broadcast %242 : vector<1x16xf32> to vector<8x16xf32>
    %244 = arith.mulf %11, %243 : vector<8x16xf32>
    %245 = arith.addf %241, %244 : vector<8x16xf32>
    %cst_76 = arith.constant 5.000000e-01 : f32
    %246 = vector.broadcast %cst_76 : f32 to vector<8x16xf32>
    %247 = arith.mulf %245, %246 : vector<8x16xf32>
    %cst_77 = arith.constant dense<0xFF800000> : vector<16xf32>
    %248 = vector.multi_reduction <maximumf>, %247, %cst_77 [0] : vector<8x16xf32> to vector<16xf32>
    %249 = vector.shape_cast %248 : vector<16xf32> to vector<1x16xf32>
    %250 = vector.broadcast %249 : vector<1x16xf32> to vector<8x16xf32>
    %251 = arith.subf %247, %250 : vector<8x16xf32>
    %252 = math.exp %251 : vector<8x16xf32>
    %cst_78 = arith.constant dense<0.000000e+00> : vector<16xf32>
    %253 = vector.multi_reduction <add>, %252, %cst_78 [0] : vector<8x16xf32> to vector<16xf32>
    %254 = vector.shape_cast %253 : vector<16xf32> to vector<1x16xf32>
    %255 = tpu.reciprocal %254 {approx = true} : vector<1x16xf32> -> vector<1x16xf32>
    %256 = vector.broadcast %255 : vector<1x16xf32> to vector<8x16xf32>
    %257 = arith.mulf %252, %256 : vector<8x16xf32>
    %c69 = arith.constant 69 : index
    %c0_79 = arith.constant 0 : index
    %258 = vector.load %arg8[%c69, %c0_79] : memref<96x16xf32, #tpu.memory_space<vmem>>, vector<1x16xf32>
    %259 = vector.broadcast %258 : vector<1x16xf32> to vector<8x16xf32>
    %260 = arith.mulf %257, %259 : vector<8x16xf32>
    %261 = arith.addf %218, %260 : vector<8x16xf32>
    %c77 = arith.constant 77 : index
    %c0_80 = arith.constant 0 : index
    %262 = vector.load %arg8[%c77, %c0_80] : memref<96x16xf32, #tpu.memory_space<vmem>>, vector<1x16xf32>
    %263 = vector.broadcast %262 : vector<1x16xf32> to vector<8x16xf32>
    %264 = arith.mulf %257, %263 : vector<8x16xf32>
    %265 = arith.addf %222, %264 : vector<8x16xf32>
    %c85 = arith.constant 85 : index
    %c0_81 = arith.constant 0 : index
    %266 = vector.load %arg8[%c85, %c0_81] : memref<96x16xf32, #tpu.memory_space<vmem>>, vector<1x16xf32>
    %267 = vector.broadcast %266 : vector<1x16xf32> to vector<8x16xf32>
    %268 = arith.mulf %257, %267 : vector<8x16xf32>
    %269 = arith.addf %226, %268 : vector<8x16xf32>
    %c93 = arith.constant 93 : index
    %c0_82 = arith.constant 0 : index
    %270 = vector.load %arg8[%c93, %c0_82] : memref<96x16xf32, #tpu.memory_space<vmem>>, vector<1x16xf32>
    %271 = vector.broadcast %270 : vector<1x16xf32> to vector<8x16xf32>
    %272 = arith.mulf %257, %271 : vector<8x16xf32>
    %273 = arith.addf %230, %272 : vector<8x16xf32>
    %c6 = arith.constant 6 : index
    %c0_83 = arith.constant 0 : index
    %274 = vector.load %arg8[%c6, %c0_83] : memref<96x16xf32, #tpu.memory_space<vmem>>, vector<1x16xf32>
    %275 = vector.broadcast %274 : vector<1x16xf32> to vector<8x16xf32>
    %276 = arith.mulf %8, %275 : vector<8x16xf32>
    %c14 = arith.constant 14 : index
    %c0_84 = arith.constant 0 : index
    %277 = vector.load %arg8[%c14, %c0_84] : memref<96x16xf32, #tpu.memory_space<vmem>>, vector<1x16xf32>
    %278 = vector.broadcast %277 : vector<1x16xf32> to vector<8x16xf32>
    %279 = arith.mulf %9, %278 : vector<8x16xf32>
    %280 = arith.addf %276, %279 : vector<8x16xf32>
    %c22 = arith.constant 22 : index
    %c0_85 = arith.constant 0 : index
    %281 = vector.load %arg8[%c22, %c0_85] : memref<96x16xf32, #tpu.memory_space<vmem>>, vector<1x16xf32>
    %282 = vector.broadcast %281 : vector<1x16xf32> to vector<8x16xf32>
    %283 = arith.mulf %10, %282 : vector<8x16xf32>
    %284 = arith.addf %280, %283 : vector<8x16xf32>
    %c30 = arith.constant 30 : index
    %c0_86 = arith.constant 0 : index
    %285 = vector.load %arg8[%c30, %c0_86] : memref<96x16xf32, #tpu.memory_space<vmem>>, vector<1x16xf32>
    %286 = vector.broadcast %285 : vector<1x16xf32> to vector<8x16xf32>
    %287 = arith.mulf %11, %286 : vector<8x16xf32>
    %288 = arith.addf %284, %287 : vector<8x16xf32>
    %cst_87 = arith.constant 5.000000e-01 : f32
    %289 = vector.broadcast %cst_87 : f32 to vector<8x16xf32>
    %290 = arith.mulf %288, %289 : vector<8x16xf32>
    %cst_88 = arith.constant dense<0xFF800000> : vector<16xf32>
    %291 = vector.multi_reduction <maximumf>, %290, %cst_88 [0] : vector<8x16xf32> to vector<16xf32>
    %292 = vector.shape_cast %291 : vector<16xf32> to vector<1x16xf32>
    %293 = vector.broadcast %292 : vector<1x16xf32> to vector<8x16xf32>
    %294 = arith.subf %290, %293 : vector<8x16xf32>
    %295 = math.exp %294 : vector<8x16xf32>
    %cst_89 = arith.constant dense<0.000000e+00> : vector<16xf32>
    %296 = vector.multi_reduction <add>, %295, %cst_89 [0] : vector<8x16xf32> to vector<16xf32>
    %297 = vector.shape_cast %296 : vector<16xf32> to vector<1x16xf32>
    %298 = tpu.reciprocal %297 {approx = true} : vector<1x16xf32> -> vector<1x16xf32>
    %299 = vector.broadcast %298 : vector<1x16xf32> to vector<8x16xf32>
    %300 = arith.mulf %295, %299 : vector<8x16xf32>
    %c70 = arith.constant 70 : index
    %c0_90 = arith.constant 0 : index
    %301 = vector.load %arg8[%c70, %c0_90] : memref<96x16xf32, #tpu.memory_space<vmem>>, vector<1x16xf32>
    %302 = vector.broadcast %301 : vector<1x16xf32> to vector<8x16xf32>
    %303 = arith.mulf %300, %302 : vector<8x16xf32>
    %304 = arith.addf %261, %303 : vector<8x16xf32>
    %c78 = arith.constant 78 : index
    %c0_91 = arith.constant 0 : index
    %305 = vector.load %arg8[%c78, %c0_91] : memref<96x16xf32, #tpu.memory_space<vmem>>, vector<1x16xf32>
    %306 = vector.broadcast %305 : vector<1x16xf32> to vector<8x16xf32>
    %307 = arith.mulf %300, %306 : vector<8x16xf32>
    %308 = arith.addf %265, %307 : vector<8x16xf32>
    %c86 = arith.constant 86 : index
    %c0_92 = arith.constant 0 : index
    %309 = vector.load %arg8[%c86, %c0_92] : memref<96x16xf32, #tpu.memory_space<vmem>>, vector<1x16xf32>
    %310 = vector.broadcast %309 : vector<1x16xf32> to vector<8x16xf32>
    %311 = arith.mulf %300, %310 : vector<8x16xf32>
    %312 = arith.addf %269, %311 : vector<8x16xf32>
    %c94 = arith.constant 94 : index
    %c0_93 = arith.constant 0 : index
    %313 = vector.load %arg8[%c94, %c0_93] : memref<96x16xf32, #tpu.memory_space<vmem>>, vector<1x16xf32>
    %314 = vector.broadcast %313 : vector<1x16xf32> to vector<8x16xf32>
    %315 = arith.mulf %300, %314 : vector<8x16xf32>
    %316 = arith.addf %273, %315 : vector<8x16xf32>
    %c7 = arith.constant 7 : index
    %c0_94 = arith.constant 0 : index
    %317 = vector.load %arg8[%c7, %c0_94] : memref<96x16xf32, #tpu.memory_space<vmem>>, vector<1x16xf32>
    %318 = vector.broadcast %317 : vector<1x16xf32> to vector<8x16xf32>
    %319 = arith.mulf %8, %318 : vector<8x16xf32>
    %c15 = arith.constant 15 : index
    %c0_95 = arith.constant 0 : index
    %320 = vector.load %arg8[%c15, %c0_95] : memref<96x16xf32, #tpu.memory_space<vmem>>, vector<1x16xf32>
    %321 = vector.broadcast %320 : vector<1x16xf32> to vector<8x16xf32>
    %322 = arith.mulf %9, %321 : vector<8x16xf32>
    %323 = arith.addf %319, %322 : vector<8x16xf32>
    %c23 = arith.constant 23 : index
    %c0_96 = arith.constant 0 : index
    %324 = vector.load %arg8[%c23, %c0_96] : memref<96x16xf32, #tpu.memory_space<vmem>>, vector<1x16xf32>
    %325 = vector.broadcast %324 : vector<1x16xf32> to vector<8x16xf32>
    %326 = arith.mulf %10, %325 : vector<8x16xf32>
    %327 = arith.addf %323, %326 : vector<8x16xf32>
    %c31 = arith.constant 31 : index
    %c0_97 = arith.constant 0 : index
    %328 = vector.load %arg8[%c31, %c0_97] : memref<96x16xf32, #tpu.memory_space<vmem>>, vector<1x16xf32>
    %329 = vector.broadcast %328 : vector<1x16xf32> to vector<8x16xf32>
    %330 = arith.mulf %11, %329 : vector<8x16xf32>
    %331 = arith.addf %327, %330 : vector<8x16xf32>
    %cst_98 = arith.constant 5.000000e-01 : f32
    %332 = vector.broadcast %cst_98 : f32 to vector<8x16xf32>
    %333 = arith.mulf %331, %332 : vector<8x16xf32>
    %cst_99 = arith.constant dense<0xFF800000> : vector<16xf32>
    %334 = vector.multi_reduction <maximumf>, %333, %cst_99 [0] : vector<8x16xf32> to vector<16xf32>
    %335 = vector.shape_cast %334 : vector<16xf32> to vector<1x16xf32>
    %336 = vector.broadcast %335 : vector<1x16xf32> to vector<8x16xf32>
    %337 = arith.subf %333, %336 : vector<8x16xf32>
    %338 = math.exp %337 : vector<8x16xf32>
    %cst_100 = arith.constant dense<0.000000e+00> : vector<16xf32>
    %339 = vector.multi_reduction <add>, %338, %cst_100 [0] : vector<8x16xf32> to vector<16xf32>
    %340 = vector.shape_cast %339 : vector<16xf32> to vector<1x16xf32>
    %341 = tpu.reciprocal %340 {approx = true} : vector<1x16xf32> -> vector<1x16xf32>
    %342 = vector.broadcast %341 : vector<1x16xf32> to vector<8x16xf32>
    %343 = arith.mulf %338, %342 : vector<8x16xf32>
    %c71 = arith.constant 71 : index
    %c0_101 = arith.constant 0 : index
    %344 = vector.load %arg8[%c71, %c0_101] : memref<96x16xf32, #tpu.memory_space<vmem>>, vector<1x16xf32>
    %345 = vector.broadcast %344 : vector<1x16xf32> to vector<8x16xf32>
    %346 = arith.mulf %343, %345 : vector<8x16xf32>
    %347 = arith.addf %304, %346 : vector<8x16xf32>
    %c79 = arith.constant 79 : index
    %c0_102 = arith.constant 0 : index
    %348 = vector.load %arg8[%c79, %c0_102] : memref<96x16xf32, #tpu.memory_space<vmem>>, vector<1x16xf32>
    %349 = vector.broadcast %348 : vector<1x16xf32> to vector<8x16xf32>
    %350 = arith.mulf %343, %349 : vector<8x16xf32>
    %351 = arith.addf %308, %350 : vector<8x16xf32>
    %c87 = arith.constant 87 : index
    %c0_103 = arith.constant 0 : index
    %352 = vector.load %arg8[%c87, %c0_103] : memref<96x16xf32, #tpu.memory_space<vmem>>, vector<1x16xf32>
    %353 = vector.broadcast %352 : vector<1x16xf32> to vector<8x16xf32>
    %354 = arith.mulf %343, %353 : vector<8x16xf32>
    %355 = arith.addf %312, %354 : vector<8x16xf32>
    %c95 = arith.constant 95 : index
    %c0_104 = arith.constant 0 : index
    %356 = vector.load %arg8[%c95, %c0_104] : memref<96x16xf32, #tpu.memory_space<vmem>>, vector<1x16xf32>
    %357 = vector.broadcast %356 : vector<1x16xf32> to vector<8x16xf32>
    %358 = arith.mulf %343, %357 : vector<8x16xf32>
    %359 = arith.addf %316, %358 : vector<8x16xf32>
    %360 = tpu.concatenate %347, %351, %355, %359 in 0 : vector<8x16xf32>, vector<8x16xf32>, vector<8x16xf32>, vector<8x16xf32> -> vector<32x16xf32>
    %c0_105 = arith.constant 0 : index
    %c0_106 = arith.constant 0 : index
    %361 = vector.load %arg5[%c0_105, %c0_106] : memref<16x32xf32, #tpu.memory_space<vmem>>, vector<16x32xf32>
    %cst_107 = arith.constant dense<0.000000e+00> : vector<16x16xf32>
    %362 = tpu.matmul %361, %360, %cst_107 {dimension_numbers = #tpu.dot_dimension_numbers<[1], [0], [0], [1], [0, 0, 1, 1], [], []>} : vector<16x32xf32>, vector<32x16xf32>, vector<16x16xf32> -> vector<16x16xf32>
    %c0_108 = arith.constant 0 : index
    %c0_109 = arith.constant 0 : index
    %363 = vector.load %arg6[%c0_108, %c0_109] : memref<16x1xf32, #tpu.memory_space<vmem>>, vector<16x1xf32>
    %364 = vector.broadcast %363 : vector<16x1xf32> to vector<16x16xf32>
    %365 = arith.addf %362, %364 : vector<16x16xf32>
    %366 = arith.addf %1, %365 : vector<16x16xf32>
    %c0_110 = arith.constant 0 : index
    %c0_111 = arith.constant 0 : index
    %c0_112 = arith.constant 0 : index
    %367 = vector.load %arg7[%c0_110, %c0_111, %c0_112] : memref<1x16x16xf32, #tpu.memory_space<vmem>>, vector<1x16x16xf32>
    %368 = vector.shape_cast %367 : vector<1x16x16xf32> to vector<16x16xf32>
    %369 = vector.shape_cast %366 : vector<16x16xf32> to vector<1x16x16xf32>
    tpu.vector_store %arg7[%c0_110, %c0_111, %c0_112], %369 {strides = array<i32>} : memref<1x16x16xf32, #tpu.memory_space<vmem>>, vector<1x16x16xf32>,
    return
  }
  func.func @transform_0(%arg0: i32, %arg1: i32) -> (i32, i32, i32) {
    %c0_i32 = arith.constant 0 : i32
    %c0_i32_0 = arith.constant 0 : i32
    return %arg0, %c0_i32, %arg1 : i32, i32, i32
  }
  func.func @transform_1(%arg0: i32, %arg1: i32) -> (i32, i32) {
    %c0_i32 = arith.constant 0 : i32
    %c0_i32_0 = arith.constant 0 : i32
    %c0_i32_1 = arith.constant 0 : i32
    return %c0_i32, %c0_i32_0 : i32, i32
  }
  func.func @transform_2(%arg0: i32, %arg1: i32) -> (i32, i32) {
    %c0_i32 = arith.constant 0 : i32
    %c0_i32_0 = arith.constant 0 : i32
    %c0_i32_1 = arith.constant 0 : i32
    return %c0_i32, %c0_i32_0 : i32, i32
  }
  func.func @transform_3(%arg0: i32, %arg1: i32) -> (i32, i32) {
    %c0_i32 = arith.constant 0 : i32
    %c0_i32_0 = arith.constant 0 : i32
    %c0_i32_1 = arith.constant 0 : i32
    return %c0_i32, %c0_i32_0 : i32, i32
  }
  func.func @transform_4(%arg0: i32, %arg1: i32) -> (i32, i32) {
    %c0_i32 = arith.constant 0 : i32
    %c0_i32_0 = arith.constant 0 : i32
    %c0_i32_1 = arith.constant 0 : i32
    return %c0_i32, %c0_i32_0 : i32, i32
  }
  func.func @transform_5(%arg0: i32, %arg1: i32) -> (i32, i32, i32) {
    %c0_i32 = arith.constant 0 : i32
    %c0_i32_0 = arith.constant 0 : i32
    return %arg0, %c0_i32, %arg1 : i32, i32, i32
  }
}

</mosaic_0001>

<bundles_post_ra>
// kernel: tpu_custom_call.1
= control target key start
LH: loop header
LB: loop body
LE: loop exit
PB: predicated region body
PF: predicated region fallthrough
CT: control target
= control target key end

     0   :  { %10 = vsyncpa [#allocation4], 0  ;;  %s2011_s0 = inlined_call_operand.vmem [shape: f32[2,16,16], index: 0, kind: input, shape index: {}]   ;;  %s2012_s1 = inlined_call_operand.vmem [shape: f32[96,16], index: 1, kind: input, shape index: {}]   ;;  %s2013_s2 = inlined_call_operand.vmem [shape: f32[96,1], index: 2, kind: input, shape index: {}]   ;;  %s2014_s3 = inlined_call_operand.vmem [shape: f32[16,32], index: 3, kind: input, shape index: {}]   ;;  %s2015_s4 = inlined_call_operand.vmem [shape: f32[16,1], index: 4, kind: input, shape index: {}]   ;;  %s2016_s5 = inlined_call_operand.hbm [shape: f32[2,16,16], index: 5, kind: output, shape index: {}]  }
   0x1   :  { %12 = vsyncpa [#allocation4 + $0x1], 0  ;;  %s1659_s18 = smov 0   ;;  %s1661_s19 = smov 0  }
   0x2   :  { %s1663_s20 = smov 0   ;;  %s1665_s21 = smov 0  }
   0x3   :  { %s1667_s22 = smov 0   ;;  %s1669_s23 = smov 0  }
   0x4 LB: > { %s1305_s24 = sadd.s32 4294967295, %s1623_s23   ;;  %s1306_s25 = sadd.s32 4294967294, %s1623_s23   ;;  %s1623_s23 = sphi %s1669_s23, %s18_s23   ;;  %s1619_s22 = sphi %s1667_s22, %s2023_s22   ;;  %s1615_s21 = sphi %s1665_s21, %s2022_s21   ;;  %s1611_s20 = sphi %s1663_s20, %s2021_s20   ;;  %s1607_s19 = sphi %s1661_s19, %s2020_s19   ;;  %s1603_s18 = sphi %s1659_s18, %s2019_s18  }
   0x5   : > { %s30_s26 = sadd.s32 1, %s1619_s22  ;;  %s151_s27 = sadd.s32 1, %s1611_s20 }
   0x6   : > { %p32_p0 = scmp.ge.s32.totalorder %s30_s26, 2  ;;  %p161_p1 = scmp.ne.s32.totalorder %s1611_s20, %s1607_s19 }
   0x7   : > { %p162_p2 = scmp.eq.s32.totalorder %s1305_s24, 1  ;;  %p167_p3 = scmp.ne.s32.totalorder %s1607_s19, %s1603_s18 }
   0x8   : > { %s2025_s26 = smov (%p32_p0, %s30_s26), 0  ;;  %p168_p5 = scmp.eq.s32.totalorder %s1306_s25, 1 }
   0x9   : > { %p1699_p4 = por %p162_p2, %p161_p1  ;;  %s146_s29 = ssub.s32 %s1619_s22, %s2025_s26 }
   0xa   : > { %p1309_p6 = scmp.ge.s32.totalorder %s1623_s23, 1  ;;  %p149_p7 = scmp.eq.s32.totalorder %s146_s29, 0 }
   0xb   : > { %p1706_p8 = por %p168_p5, %p167_p3  ;;  %p209_p9 = scmp.lt.s32.totalorder %s1623_s23, 3 }
   0xc   : > { %s1712_s6 = scalar_select %p149_p7, %s1611_s20, %s151_s27  }
   0xd   : > { %p210_p10 = pnand %p1309_p6, %p209_p9 }
   0xe   : > { %p240_p11 = scmp.lt.s32.totalorder (!%p210_p10), %s1615_s21, 1  ;;  %s237_s8 = sand.u32 (!%p210_p10), 1, %s1607_s19  }
   0xf   : > { %213 = sbr.rel (%p210_p10) target bundleno = 559 (0x22f), region = 40  ;;  %s1310_s9 = sshll.u32 (!%p210_p10), %s237_s8, 4 }
  0x10   : > { %s239_s10 = scalar_lea.vmem (!%p210_p10), [#allocation3], %s1310_s9  ;;  %s1626_s17 = smov (!%p210_p10), [#allocation3]  }
  0x11   : > { %s1551_s24 = sshll.u32 (!%p210_p10), %s1626_s17, 4  ;;  %s1552_s24 = int_to_ptr.vmem [resolvable:$false] %s1551_s24 }
  0x14   : > { %v250_v0 = vld [vmem:[%s2012_s1] sm:$0xff]  ;;  %vm334_vm0 = vcmask 130048   ;;  %s241_s11 = scalar_select %p240_p11, %s1615_s21, 1  ;;  %v1625_v2 = vmov 0   ;;  %v251_v7 = vld [vmem:[%s2012_s1 + $0x8] sm:$0xff]  ;;  %v252_v9 = vld [vmem:[%s2012_s1 + $0x10] sm:$0xff] }
  0x15   : > { %v258_v1 = vld [vmem:[%s2012_s1 + $0x40] sm:$0xff]  ;;  %1422 = vmatprep.mubr.msk.f32.mxu0 %vm334_vm0, %v250_v0  ;;  %1514 = vset.pattern.permute.xlu1 %v1625_v2  ;;  %v259_v8 = vld [vmem:[%s2012_s1 + $0x48] sm:$0xff]  ;;  %v260_v10 = vld [vmem:[%s2012_s1 + $0x50] sm:$0xff]  ;;  %vm1126_vm1 = vcmask 261120  }
  0x16   : > { %1434 = vmatprep.mubr.msk.f32.mxu1 %vm334_vm0, %v258_v1  ;;  %1513 = vset.pattern.permute.xlu0 %v1625_v2  ;;  %s1396_s12 = sshll.u32 %s241_s11, 4  ;;  %v266_v3 = vld [vmem:[%s2013_s2 + $0x20] sm:$0xff]  ;;  %v267_v11 = vld [vmem:[%s2013_s2 + $0x28] sm:$0xff]  ;;  %v253_v13 = vld [vmem:[%s2012_s1 + $0x18] sm:$0xff]  ;;  %s1227_s11 = sshll.u32 %s239_s10, 4  ;;  %s1961_s11 = int_to_ptr.vmem [resolvable:$true] %s1227_s11 }
  0x17   : > { %v262_v4 = vld [vmem:[%s2013_s2] sm:$0xff]  ;;  %s247_s25 = scalar_lea.vmem %s2011_s0, %s1396_s12  ;;  %296 = vperm.xlu1 %1514, %v266_v3   ;;  %v263_v12 = vld [vmem:[%s2013_s2 + $0x8] sm:$0xff]  ;;  %v261_v14 = vld [vmem:[%s2012_s1 + $0x58] sm:$0xff]  ;;  %s1397_s12 = sshll.u32 %s1615_s21, 8 }
  0x18   : > { %276 = vperm.xlu0 %1513, %v262_v4   ;;  %v1733_v5 = vld [vmem:[%s247_s25 + $0x8] sm:$0xff]  ;;  %v1735_v6 = vld [vmem:[%s247_s25] sm:$0xff]  ;;  %v268_v16 = vld [vmem:[%s2013_s2 + $0x30] sm:$0xff]  ;;  %s1959_s15 = scalar_lea.hbm %s2016_s5, %s1397_s12  ;;  %s1966_s21 = scalar_lea.sflag [#allocation4], %s237_s8 }
  0x19   : > { %1418 = vmatprep.subr.mxu0 %v1733_v5  ;;  %1451 = vmatprep.subr.mxu1 %v1733_v5  ;;  %v254_v15 = vld [vmem:[%s2012_s1 + $0x20] sm:$0xff]  ;;  %v264_v17 = vld [vmem:[%s2013_s2 + $0x10] sm:$0xff]  ;;  %v255_v18 = vld [vmem:[%s2012_s1 + $0x28] sm:$0xff]  ;;  %s1547_s16 = scalar_lea.vmem %s1961_s11, 256  ;;  %s1553_s25 = scalar_lea.vmem %s1552_s24, 512 }
  0x1a   : > { %1419 = vmatpush3.msra.mxu0 %v1733_v5  ;;  %1453 = vmatpush3.msra.mxu1 %v1733_v5  ;;  %v256_v19 = vld [vmem:[%s2012_s1 + $0x30] sm:$0xff]  ;;  %v269_v20 = vld [vmem:[%s2013_s2 + $0x38] sm:$0xff]  ;;  %v270_v25 = vld [vmem:[%s2013_s2 + $0x40] sm:$0xff]  ;;  %p1548_p12 = scmp.ne.s32.totalorder %s1961_s11, %s1547_s16  ;;  %p1554_p1 = scmp.lt.s32.totalorder %s1961_s11, %s1552_s24 }
  0x1b   : > { %1420 = vmatprep.subr.mxu0 %v1735_v6  ;;  %1452 = vmatprep.subr.mxu1 %v1735_v6  ;;  %v265_v21 = vld [vmem:[%s2013_s2 + $0x18] sm:$0xff]  ;;  %v272_v23 = vld [vmem:[%s2013_s2 + $0x50] sm:$0xff]  ;;  %v271_v26 = vld [vmem:[%s2013_s2 + $0x48] sm:$0xff]  ;;  %p1555_p2 = scmp.lt.s32.totalorder %s1553_s25, %s1547_s16 }
  0x1c   : > { %1421 = vmatpush3.msra.mxu0 %v1735_v6  ;;  %1454 = vmatpush3.msra.mxu1 %v1735_v6  ;;  %v257_v22 = vld [vmem:[%s2012_s1 + $0x38] sm:$0xff]  ;;  %v1115_v27 = vld [vmem:[%s2015_s4 + $0x8] sm:$0xff]  ;;  %v1114_v28 = vld [vmem:[%s2015_s4] sm:$0xff]  ;;  %p1549_p13 = pnand %p1548_p12, %p1699_p4 }
  0x1d   : > { %1423 = vmatmul.mubr.msk.f32.vlgmr.msra.gmra.mxu0 %vm334_vm0, %v251_v7  ;;  %1435 = vmatmul.mubr.msk.f32.vlgmr.msra.gmra.mxu1 %vm334_vm0, %v259_v8  ;;  %v273_v24 = vld [vmem:[%s2013_s2 + $0x58] sm:$0xff]  ;;  %v1112_v39 = vld [vmem:[%s2014_s3] sm:$0xff]  ;;  %p1556_p3 = por %p1555_p2, %p1554_p1 }
  0x1e   : > { %1425 = vmatprep.mubr.msk.f32.mxu0 %vm334_vm0, %v252_v9  ;;  %1437 = vmatprep.mubr.msk.f32.mxu1 %vm334_vm0, %v260_v10  ;;  %p1550_p0 = pneg %p1549_p13 }
  0x1f   : > { %301 = vperm.xlu1 %1514, %v267_v11   ;;  %281 = vperm.xlu0 %1513, %v263_v12  }
  0x20   : > { %p1557_p5 = pnand %p1556_p3, %p1550_p0 }
  0x21   : > { %1426 = vmatmul.mubr.msk.f32.gmra.mxu0 %vm334_vm0, %v253_v13  ;;  %1438 = vmatmul.mubr.msk.f32.gmra.mxu1 %vm334_vm0, %v261_v14 }
  0x22   : > { %1428 = vmatprep.mubr.msk.f32.mxu0 %vm334_vm0, %v254_v15  ;;  %1448 = vmatprep.mubr.msk.f32.mxu1 %vm1126_vm1, %v1112_v39 }
  0x23   : > { %306 = vperm.xlu1 %1514, %v268_v16   ;;  %286 = vperm.xlu0 %1513, %v264_v17  }
  0x25   : > { %1429 = vmatmul.mubr.msk.f32.gmra.mxu0 %vm334_vm0, %v255_v18 }
  0x26   : > { %1431 = vmatprep.mubr.msk.f32.mxu0 %vm334_vm0, %v256_v19 }
  0x27   : > { %311 = vperm.xlu1 %1514, %v269_v20   ;;  %291 = vperm.xlu0 %1513, %v265_v21  }
  0x29   : > { %1432 = vmatmul.mubr.msk.f32.gmra.mxu0 %vm334_vm0, %v257_v22 }
  0x2b   : > { %326 = vperm.xlu1 %1514, %v272_v23   ;;  %331 = vperm.xlu0 %1513, %v273_v24  }
  0x2f   : > { %316 = vperm.xlu1 %1514, %v270_v25   ;;  %321 = vperm.xlu0 %1513, %v271_v26  }
  0x33   : > { %1123 = vperm.xlu1 %1514, %v1115_v27   ;;  %1118 = vperm.xlu0 %1513, %v1114_v28  }
  0x92   : > { %v297_v30 = vpop.permute.xlu1 %296 }
  0x93   : > { %v277_v29 = vpop.permute.xlu0 %276 }
  0x9a   : > { %v282_v31 = vpop.permute.xlu0 %281  ;;  %v302_v32 = vpop.permute.xlu1 %301 }
  0x9e   : > { %v287_v33 = vpop.permute.xlu0 %286  ;;  %v307_v34 = vpop.permute.xlu1 %306 }
  0xa2   : > { %v292_v35 = vpop.permute.xlu0 %291  ;;  %v312_v36 = vpop.permute.xlu1 %311 }
  0xa6   : > { %v332_v37 = vpop.permute.xlu0 %331  ;;  %v327_v38 = vpop.permute.xlu1 %326 }
  0xaa   : > { %v322_v40 = vpop.permute.xlu0 %321  ;;  %v317_v43 = vpop.permute.xlu1 %316 }
  0xdd   : > { %v1424_v41 = vpop.f32.mrf.mxu0  ;;  %v1436_v42 = vpop.f32.mrf.mxu1 }
  0xde   : > { %v443_v44 = vadd.f32 %v1424_v41, %v282_v31  ;;  %v483_v45 = vadd.f32 %v1436_v42, %v322_v40 }
  0xdf   : > { %v437_v46 = vpop.f32.mrf.mxu0  ;;  %v477_v47 = vpop.f32.mrf.mxu1 }
  0xe0   : > { %497 = vst.msk [vmem:[#allocation2 + $0x8] sm:$0xff] %vm334_vm0, %v443_v44  ;;  %505 = vst.msk [vmem:[#allocation2 + $0x48] sm:$0xff] %vm334_vm0, %v483_v45  ;;  %v438_v48 = vadd.f32 %v437_v46, %v277_v29  ;;  %v478_v49 = vadd.f32 %v477_v47, %v317_v43 }
  0xe1   : > { %v1427_v50 = vpop.f32.mrf.mxu0  ;;  %v1439_v51 = vpop.f32.mrf.mxu1 }
  0xe2   : > { %496 = vst.msk [vmem:[#allocation2] sm:$0xff] %vm334_vm0, %v438_v48  ;;  %504 = vst.msk [vmem:[#allocation2 + $0x40] sm:$0xff] %vm334_vm0, %v478_v49  ;;  %v453_v52 = vadd.f32 %v1427_v50, %v292_v35  ;;  %v493_v53 = vadd.f32 %v1439_v51, %v332_v37 }
  0xe3   : > { %v447_v54 = vpop.f32.mrf.mxu0  ;;  %v487_v55 = vpop.f32.mrf.mxu1 }
  0xe4   : > { %499 = vst.msk [vmem:[#allocation2 + $0x18] sm:$0xff] %vm334_vm0, %v453_v52  ;;  %507 = vst.msk [vmem:[#allocation2 + $0x58] sm:$0xff] %vm334_vm0, %v493_v53  ;;  %v448_v56 = vadd.f32 %v447_v54, %v287_v33  ;;  %v488_v57 = vadd.f32 %v487_v55, %v327_v38 }
  0xe5   : > { %v1430_v58 = vpop.f32.mrf.mxu0 }
  0xe6   : > { %498 = vst.msk [vmem:[#allocation2 + $0x10] sm:$0xff] %vm334_vm0, %v448_v56  ;;  %506 = vst.msk [vmem:[#allocation2 + $0x50] sm:$0xff] %vm334_vm0, %v488_v57  ;;  %v463_v59 = vadd.f32 %v1430_v58, %v302_v32 }
  0xe7   : > { %v457_v60 = vpop.f32.mrf.mxu0  ;;  %v1326_v2 = vld [vmem:[#allocation2 + $0x8] ss:$0 sm:$0xff]  ;;  %v1334_v3 = vld [vmem:[#allocation2 + $0x9] ss:$0 sm:$0xff]  ;;  %v1342_v4 = vld [vmem:[#allocation2 + $0xa] ss:$0 sm:$0xff] }
  0xe8   : > { %501 = vst.msk [vmem:[#allocation2 + $0x28] sm:$0xff] %vm334_vm0, %v463_v59  ;;  %v458_v61 = vadd.f32 %v457_v60, %v297_v30  ;;  %v1350_v7 = vld [vmem:[#allocation2 + $0xb] ss:$0 sm:$0xff]  ;;  %v1358_v26 = vld [vmem:[#allocation2 + $0xc] ss:$0 sm:$0xff] }
  0xe9   : > { %v1433_v62 = vpop.f32.mrf.mxu0  ;;  %v1325_v8 = vld [vmem:[#allocation2] ss:$0 sm:$0xff]  ;;  %v1333_v9 = vld [vmem:[#allocation2 + $0x1] ss:$0 sm:$0xff]  ;;  %v1341_v12 = vld [vmem:[#allocation2 + $0x2] ss:$0 sm:$0xff] }
  0xea   : > { %500 = vst.msk [vmem:[#allocation2 + $0x20] sm:$0xff] %vm334_vm0, %v458_v61  ;;  %v473_v63 = vadd.f32 %v1433_v62, %v312_v36  ;;  %v1349_v13 = vld [vmem:[#allocation2 + $0x3] ss:$0 sm:$0xff]  ;;  %v1357_v41 = vld [vmem:[#allocation2 + $0x4] ss:$0 sm:$0xff] }
  0xeb   : > { %v467_v0 = vpop.f32.mrf.mxu0  ;;  %v1328_v14 = vld [vmem:[#allocation2 + $0x18] ss:$0 sm:$0xff]  ;;  %v1336_v19 = vld [vmem:[#allocation2 + $0x19] ss:$0 sm:$0xff]  ;;  %v1344_v20 = vld [vmem:[#allocation2 + $0x1a] ss:$0 sm:$0xff] }
  0xec   : > { %503 = vst.msk [vmem:[#allocation2 + $0x38] sm:$0xff] %vm334_vm0, %v473_v63  ;;  %v468_v1 = vadd.f32 %v467_v0, %v307_v34  ;;  %v1352_v27 = vld [vmem:[#allocation2 + $0x1b] ss:$0 sm:$0xff]  ;;  %v1360_v42 = vld [vmem:[#allocation2 + $0x1c] ss:$0 sm:$0xff] }
  0xed   : > { %v1327_v28 = vld [vmem:[#allocation2 + $0x10] ss:$0 sm:$0xff]  ;;  %v1335_v29 = vld [vmem:[#allocation2 + $0x11] ss:$0 sm:$0xff]  ;;  %v1343_v34 = vld [vmem:[#allocation2 + $0x12] ss:$0 sm:$0xff] }
  0xee   : > { %502 = vst.msk [vmem:[#allocation2 + $0x30] sm:$0xff] %vm334_vm0, %v468_v1  ;;  %v1351_v35 = vld [vmem:[#allocation2 + $0x13] ss:$0 sm:$0xff]  ;;  %v1359_v43 = vld [vmem:[#allocation2 + $0x14] ss:$0 sm:$0xff] }
  0xef   : > { %v1837_v10 = vld [vmem:[#allocation2 + $0x28] sm:$0xff]  ;;  %v1365_v53 = vld [vmem:[#allocation2 + $0x5] ss:$0 sm:$0xff]  ;;  %v1367_v54 = vld [vmem:[#allocation2 + $0x15] ss:$0 sm:$0xff] }
  0xf0   : > { %v523_v16 = vmul.f32 %v1326_v2, %v1837_v10  ;;  %v598_v18 = vmul.f32 %v1334_v3, %v1837_v10  ;;  %v673_v23 = vmul.f32 %v1342_v4, %v1837_v10  ;;  %v748_v25 = vmul.f32 %v1350_v7, %v1837_v10  ;;  %v1366_v52 = vld [vmem:[#allocation2 + $0xd] ss:$0 sm:$0xff]  ;;  %v1373_v63 = vld [vmem:[#allocation2 + $0x6] ss:$0 sm:$0xff]  ;;  %v1368_v0 = vld [vmem:[#allocation2 + $0x1d] ss:$0 sm:$0xff] }
  0xf1   : > { %v1839_v11 = vld [vmem:[#allocation2 + $0x20] sm:$0xff]  ;;  %v823_v49 = vmul.f32 %v1358_v26, %v1837_v10  ;;  %v898_v61 = vmul.f32 %v1366_v52, %v1837_v10  ;;  %v1374_v7 = vld [vmem:[#allocation2 + $0xe] ss:$0 sm:$0xff] }
  0xf2   : > { %v517_v15 = vmul.f32 %v1325_v8, %v1839_v11  ;;  %v592_v17 = vmul.f32 %v1333_v9, %v1839_v11  ;;  %v667_v22 = vmul.f32 %v1341_v12, %v1839_v11  ;;  %v742_v24 = vmul.f32 %v1349_v13, %v1839_v11 }
  0xf3   : > { %v1845_v21 = vld [vmem:[#allocation2 + $0x38] sm:$0xff]  ;;  %v817_v48 = vmul.f32 %v1357_v41, %v1839_v11  ;;  %v892_v60 = vmul.f32 %v1365_v53, %v1839_v11  ;;  %v967_v13 = vmul.f32 %v1373_v63, %v1839_v11  ;;  %v1383_v63 = vld [vmem:[#allocation2 + $0x17] ss:$0 sm:$0xff] }
  0xf4   : > { %v524_v30 = vadd.f32 %v523_v16, %v517_v15  ;;  %v537_v31 = vmul.f32 %v1328_v14, %v1845_v21  ;;  %v599_v32 = vadd.f32 %v598_v18, %v592_v17  ;;  %v612_v33 = vmul.f32 %v1336_v19, %v1845_v21  ;;  %v1375_v14 = vld [vmem:[#allocation2 + $0x16] ss:$0 sm:$0xff] }
  0xf5   : > { %v1853_v36 = vld [vmem:[#allocation2 + $0x30] sm:$0xff]  ;;  %v674_v37 = vadd.f32 %v673_v23, %v667_v22  ;;  %v687_v38 = vmul.f32 %v1344_v20, %v1845_v21  ;;  %v749_v39 = vadd.f32 %v748_v25, %v742_v24  ;;  %v762_v40 = vmul.f32 %v1352_v27, %v1845_v21 }
  0xf6   : > { %v530_v44 = vmul.f32 %v1327_v28, %v1853_v36  ;;  %v605_v45 = vmul.f32 %v1335_v29, %v1853_v36  ;;  %v680_v46 = vmul.f32 %v1343_v34, %v1853_v36  ;;  %v755_v47 = vmul.f32 %v1351_v35, %v1853_v36  ;;  %v1376_v28 = vld [vmem:[#allocation2 + $0x1e] ss:$0 sm:$0xff] }
  0xf7   : > { %v830_v50 = vmul.f32 %v1359_v43, %v1853_v36  ;;  %v837_v51 = vmul.f32 %v1360_v42, %v1845_v21  ;;  %v824_v59 = vadd.f32 %v823_v49, %v817_v48  ;;  %v905_v62 = vmul.f32 %v1367_v54, %v1853_v36 }
  0xf8   : > { %v531_v55 = vadd.f32 %v530_v44, %v524_v30  ;;  %v606_v56 = vadd.f32 %v605_v45, %v599_v32  ;;  %v681_v57 = vadd.f32 %v680_v46, %v674_v37  ;;  %v756_v58 = vadd.f32 %v755_v47, %v749_v39  ;;  %v1382_v47 = vld [vmem:[#allocation2 + $0xf] ss:$0 sm:$0xff] }
  0xf9   : > { %v831_v8 = vadd.f32 %v830_v50, %v824_v59  ;;  %v899_v9 = vadd.f32 %v898_v61, %v892_v60  ;;  %v912_v12 = vmul.f32 %v1368_v0, %v1845_v21  ;;  %v973_v22 = vmul.f32 %v1374_v7, %v1837_v10 }
  0xfa   : > { %v538_v1 = vadd.f32 %v537_v31, %v531_v55  ;;  %v613_v2 = vadd.f32 %v612_v33, %v606_v56  ;;  %v688_v3 = vadd.f32 %v687_v38, %v681_v57  ;;  %v763_v4 = vadd.f32 %v762_v40, %v756_v58  ;;  %v1381_v38 = vld [vmem:[#allocation2 + $0x7] ss:$0 sm:$0xff] }
  0xfb   : > { %v838_v19 = vadd.f32 %v837_v51, %v831_v8  ;;  %v906_v20 = vadd.f32 %v905_v62, %v899_v9  ;;  %v980_v23 = vmul.f32 %v1375_v14, %v1853_v36  ;;  %v974_v35 = vadd.f32 %v973_v22, %v967_v13 }
  0xfc   : > { %v1870_v15 = vmul.f32 0.5, %v538_v1  ;;  %v1872_v16 = vmul.f32 0.5, %v613_v2  ;;  %v1874_v17 = vmul.f32 0.5, %v688_v3  ;;  %v1876_v18 = vmul.f32 0.5, %v763_v4 }
  0xfd   : > { %v1888_v33 = vmul.f32 0.5, %v838_v19  ;;  %v913_v34 = vadd.f32 %v912_v12, %v906_v20  ;;  %v987_v37 = vmul.f32 %v1376_v28, %v1845_v21  ;;  %v981_v45 = vadd.f32 %v980_v23, %v974_v35 }
  0xfe   : > { %v540_v24 = vsel %vm334_vm0, %v1870_v15, -inf  ;;  %v615_v25 = vsel %vm334_vm0, %v1872_v16, -inf  ;;  %v690_v26 = vsel %vm334_vm0, %v1874_v17, -inf  ;;  %v765_v27 = vsel %vm334_vm0, %v1876_v18, -inf }
  0xff   : > { %v541_v29 = vrot.slane %v540_v24, 4  ;;  %v616_v30 = vrot.slane %v615_v25, 4  ;;  %v691_v31 = vrot.slane %v690_v26, 4  ;;  %v766_v32 = vrot.slane %v765_v27, 4 }
 0x100   : > { %v840_v43 = vsel %vm334_vm0, %v1888_v33, -inf  ;;  %v1893_v44 = vmul.f32 0.5, %v913_v34  ;;  %v1042_v46 = vmul.f32 %v1381_v38, %v1839_v11  ;;  %v988_v54 = vadd.f32 %v987_v37, %v981_v45 }
 0x101   : > { %v542_v39 = vmax.f32 %v540_v24, %v541_v29  ;;  %v617_v40 = vmax.f32 %v615_v25, %v616_v30  ;;  %v692_v41 = vmax.f32 %v690_v26, %v691_v31  ;;  %v767_v42 = vmax.f32 %v765_v27, %v766_v32 }
 0x102   : > { %v841_v52 = vrot.slane %v840_v43, 4  ;;  %v915_v53 = vsel %vm334_vm0, %v1893_v44, -inf  ;;  %v1048_v55 = vmul.f32 %v1382_v47, %v1837_v10  ;;  %v989_v62 = vmul.f32 0.5, %v988_v54 }
 0x103   : > { %v543_v48 = vrot.slane %v542_v39, 2  ;;  %v618_v49 = vrot.slane %v617_v40, 2  ;;  %v693_v50 = vrot.slane %v692_v41, 2  ;;  %v768_v51 = vrot.slane %v767_v42, 2 }
 0x104   : > { %v842_v60 = vmax.f32 %v840_v43, %v841_v52  ;;  %v916_v61 = vrot.slane %v915_v53, 4  ;;  %v1049_v11 = vadd.f32 %v1048_v55, %v1042_v46  ;;  %v990_v8 = vsel %vm334_vm0, %v989_v62, -inf }
 0x105   : > { %v544_v56 = vmax.f32 %v542_v39, %v543_v48  ;;  %v619_v57 = vmax.f32 %v617_v40, %v618_v49  ;;  %v694_v58 = vmax.f32 %v692_v41, %v693_v50  ;;  %v769_v59 = vmax.f32 %v767_v42, %v768_v51 }
 0x106   : > { %v843_v4 = vrot.slane %v842_v60, 2  ;;  %v917_v7 = vmax.f32 %v915_v53, %v916_v61  ;;  %v1055_v9 = vmul.f32 %v1383_v63, %v1853_v36  ;;  %v991_v22 = vrot.slane %v990_v8, 4  ;;  %v1384_v36 = vld [vmem:[#allocation2 + $0x1f] ss:$0 sm:$0xff] }
 0x107   : > { %v545_v0 = vrot.slane %v544_v56, 1  ;;  %v620_v1 = vrot.slane %v619_v57, 1  ;;  %v695_v2 = vrot.slane %v694_v58, 1  ;;  %v770_v3 = vrot.slane %v769_v59, 1 }
 0x108   : > { %v844_v19 = vmax.f32 %v842_v60, %v843_v4  ;;  %v918_v20 = vrot.slane %v917_v7, 2  ;;  %v1056_v23 = vadd.f32 %v1055_v9, %v1049_v11  ;;  %v992_v30 = vmax.f32 %v990_v8, %v991_v22 }
 0x109   : > { %v546_v10 = vmax.f32 %v544_v56, %v545_v0  ;;  %v621_v12 = vmax.f32 %v619_v57, %v620_v1  ;;  %v696_v13 = vmax.f32 %v694_v58, %v695_v2  ;;  %v771_v14 = vmax.f32 %v769_v59, %v770_v3 }
 0x10a   : > { %v845_v28 = vrot.slane %v844_v19, 1  ;;  %v919_v29 = vmax.f32 %v917_v7, %v918_v20  ;;  %v1062_v35 = vmul.f32 %v1384_v36, %v1845_v21  ;;  %v993_v40 = vrot.slane %v992_v30, 2 }
 0x10b   : > { %v547_v24 = vsub.f32 %v1870_v15, %v546_v10  ;;  %v622_v25 = vsub.f32 %v1872_v16, %v621_v12  ;;  %v697_v26 = vsub.f32 %v1874_v17, %v696_v13  ;;  %v772_v27 = vsub.f32 %v1876_v18, %v771_v14 }
 0x10c   : > { %v846_v38 = vmax.f32 %v844_v19, %v845_v28  ;;  %v920_v39 = vrot.slane %v919_v29, 1  ;;  %v1063_v15 = vadd.f32 %v1062_v35, %v1056_v23  ;;  %v994_v18 = vmax.f32 %v992_v30, %v993_v40 }
 0x10d   : > { %v548_v31 = vmul.f32 1.442695, %v547_v24  ;;  %v623_v32 = vmul.f32 1.442695, %v622_v25  ;;  %v698_v34 = vmul.f32 1.442695, %v697_v26 }
 0x10e   : > { %v773_v37 = vmul.f32 1.442695, %v772_v27  ;;  %v847_v16 = vsub.f32 %v1888_v33, %v846_v38  ;;  %v921_v17 = vmax.f32 %v919_v29, %v920_v39  ;;  %v1064_v41 = vmul.f32 0.5, %v1063_v15 }
 0x10f   : > { %1515 = vpow2.f32 %v548_v31  ;;  %v995_v45 = vrot.slane %v994_v18, 1 }
 0x110   : > { %1517 = vpow2.f32 %v623_v32  ;;  %v848_v42 = vmul.f32 1.442695, %v847_v16  ;;  %v922_v43 = vsub.f32 %v1893_v44, %v921_v17  ;;  %v1065_v21 = vsel %vm334_vm0, %v1064_v41, -inf }
 0x111   : > { %1519 = vpow2.f32 %v698_v34  ;;  %v996_v47 = vmax.f32 %v994_v18, %v995_v45  ;;  %v1066_v48 = vrot.slane %v1065_v21, 4 }
 0x112   : > { %1521 = vpow2.f32 %v773_v37  ;;  %v923_v46 = vmul.f32 1.442695, %v922_v43 }
 0x113   : > { %1523 = vpow2.f32 %v848_v42  ;;  %v997_v49 = vsub.f32 %v989_v62, %v996_v47  ;;  %v1067_v50 = vmax.f32 %v1065_v21, %v1066_v48 }
 0x114   : > { %1525 = vpow2.f32 %v923_v46 }
 0x115   : > { %v998_v51 = vmul.f32 1.442695, %v997_v49  ;;  %v1068_v33 = vrot.slane %v1067_v50, 2 }
 0x117   : > { %1527 = vpow2.f32 %v998_v51  ;;  %v1069_v52 = vmax.f32 %v1067_v50, %v1068_v33 }
 0x119   : > { %v1070_v54 = vrot.slane %v1069_v52, 1 }
 0x11b   : > { %v1071_v59 = vmax.f32 %v1069_v52, %v1070_v54 }
 0x11c   : > { %v1909_v53 = vpop.eup %1515 }
 0x11d   : > { %v1911_v55 = vpop.eup %1517  ;;  %v550_v44 = vsel %vm334_vm0, %v1909_v53, 0.0  ;;  %v1072_v1 = vsub.f32 %v1064_v41, %v1071_v59 }
 0x11e   : > { %v1915_v56 = vpop.eup %1519  ;;  %v551_v57 = vrot.slane %v550_v44, 4  ;;  %v625_v58 = vsel %vm334_vm0, %v1911_v55, 0.0 }
 0x11f   : > { %v1919_v60 = vpop.eup %1521  ;;  %v626_v61 = vrot.slane %v625_v58, 4  ;;  %v700_v62 = vsel %vm334_vm0, %v1915_v56, 0.0  ;;  %v1073_v10 = vmul.f32 1.442695, %v1072_v1  ;;  %v1331_v1 = vld [vmem:[#allocation2 + $0x50] ss:$0 sm:$0xff] }
 0x120   : > { %v552_v11 = vadd.f32 %v551_v57, %v550_v44  ;;  %v701_v63 = vrot.slane %v700_v62, 4  ;;  %v775_v0 = vsel %vm334_vm0, %v1919_v60, 0.0  ;;  %v1925_v2 = vpop.eup %1523 }
 0x121   : > { %v627_v3 = vadd.f32 %v626_v61, %v625_v58  ;;  %v776_v4 = vrot.slane %v775_v0, 4  ;;  %v850_v9 = vsel %vm334_vm0, %v1925_v2, 0.0  ;;  %v1929_v12 = vpop.eup %1525  ;;  %1529 = vpow2.f32 %v1073_v10 }
 0x122   : > { %v553_v7 = vrot.slane %v552_v11, 2  ;;  %v702_v8 = vadd.f32 %v701_v63, %v700_v62  ;;  %v851_v19 = vrot.slane %v850_v9, 4  ;;  %v925_v23 = vsel %vm334_vm0, %v1929_v12, 0.0 }
 0x123   : > { %v628_v13 = vrot.slane %v627_v3, 2  ;;  %v777_v14 = vadd.f32 %v776_v4, %v775_v0  ;;  %v926_v27 = vrot.slane %v925_v23, 4 }
 0x124   : > { %v554_v20 = vadd.f32 %v553_v7, %v552_v11  ;;  %v703_v22 = vrot.slane %v702_v8, 2  ;;  %v852_v26 = vadd.f32 %v851_v19, %v850_v9  ;;  %v1933_v30 = vpop.eup %1527  ;;  %v1332_v11 = vld [vmem:[#allocation2 + $0x58] ss:$0 sm:$0xff] }
 0x125   : > { %v629_v24 = vadd.f32 %v628_v13, %v627_v3  ;;  %v778_v25 = vrot.slane %v777_v14, 2  ;;  %v927_v34 = vadd.f32 %v926_v27, %v925_v23  ;;  %v1000_v38 = vsel %vm334_vm0, %v1933_v30, 0.0  ;;  %v1330_v3 = vld [vmem:[#allocation2 + $0x48] ss:$0 sm:$0xff]  ;;  %v1339_v13 = vld [vmem:[#allocation2 + $0x51] ss:$0 sm:$0xff] }
 0x126   : > { %v555_v28 = vrot.slane %v554_v20, 1  ;;  %v704_v29 = vadd.f32 %v703_v22, %v702_v8  ;;  %v853_v32 = vrot.slane %v852_v26, 2  ;;  %v1001_v18 = vrot.slane %v1000_v38, 4  ;;  %v1340_v8 = vld [vmem:[#allocation2 + $0x59] ss:$0 sm:$0xff] }
 0x127   : > { %v630_v36 = vrot.slane %v629_v24, 1  ;;  %v779_v31 = vadd.f32 %v778_v25, %v777_v14  ;;  %v928_v16 = vrot.slane %v927_v34, 2  ;;  %v1338_v23 = vld [vmem:[#allocation2 + $0x49] ss:$0 sm:$0xff]  ;;  %v1348_v25 = vld [vmem:[#allocation2 + $0x5a] ss:$0 sm:$0xff] }
 0x128   : > { %v556_v35 = vadd.f32 %v555_v28, %v554_v20  ;;  %v705_v37 = vrot.slane %v704_v29, 1  ;;  %v854_v15 = vadd.f32 %v853_v32, %v852_v26  ;;  %v1002_v45 = vadd.f32 %v1001_v18, %v1000_v38 }
 0x129   : > { %v631_v39 = vadd.f32 %v630_v36, %v629_v24  ;;  %v780_v40 = vrot.slane %v779_v31, 1  ;;  %v929_v43 = vadd.f32 %v928_v16, %v927_v34  ;;  %v1346_v36 = vld [vmem:[#allocation2 + $0x4a] ss:$0 sm:$0xff] }
 0x12a   : > { %1531 = vrcp.f32 %v556_v35  ;;  %v706_v17 = vadd.f32 %v705_v37, %v704_v29  ;;  %v855_v42 = vrot.slane %v854_v15, 1  ;;  %v1003_v47 = vrot.slane %v1002_v45, 2  ;;  %v1347_v29 = vld [vmem:[#allocation2 + $0x52] ss:$0 sm:$0xff] }
 0x12b   : > { %1533 = vrcp.f32 %v631_v39  ;;  %v781_v41 = vadd.f32 %v780_v40, %v779_v31  ;;  %v930_v46 = vrot.slane %v929_v43, 1  ;;  %v1356_v31 = vld [vmem:[#allocation2 + $0x5b] ss:$0 sm:$0xff] }
 0x12c   : > { %1535 = vrcp.f32 %v706_v17  ;;  %v856_v21 = vadd.f32 %v855_v42, %v854_v15  ;;  %v1004_v49 = vadd.f32 %v1003_v47, %v1002_v45  ;;  %v1355_v15 = vld [vmem:[#allocation2 + $0x53] ss:$0 sm:$0xff]  ;;  %v1337_v42 = vld [vmem:[#allocation2 + $0x41] ss:$0 sm:$0xff] }
 0x12d   : > { %1537 = vrcp.f32 %v781_v41  ;;  %v931_v48 = vadd.f32 %v930_v46, %v929_v43  ;;  %v1329_v41 = vld [vmem:[#allocation2 + $0x40] ss:$0 sm:$0xff]  ;;  %v1364_v43 = vld [vmem:[#allocation2 + $0x5c] ss:$0 sm:$0xff] }
 0x12e   : > { %1539 = vrcp.f32 %v856_v21  ;;  %v1937_v50 = vpop.eup %1529  ;;  %v1005_v51 = vrot.slane %v1004_v49, 1  ;;  %v1354_v21 = vld [vmem:[#allocation2 + $0x4b] ss:$0 sm:$0xff] }
 0x12f   : > { %1541 = vrcp.f32 %v931_v48  ;;  %v1075_v33 = vsel %vm334_vm0, %v1937_v50, 0.0 }
 0x130   : > { %v1076_v52 = vrot.slane %v1075_v33, 4  ;;  %v1006_v54 = vadd.f32 %v1005_v51, %v1004_v49 }
 0x132   : > { %v1077_v44 = vadd.f32 %v1076_v52, %v1075_v33  ;;  %1543 = vrcp.f32 %v1006_v54  ;;  %v1363_v52 = vld [vmem:[#allocation2 + $0x54] ss:$0 sm:$0xff]  ;;  %v1345_v54 = vld [vmem:[#allocation2 + $0x42] ss:$0 sm:$0xff] }
 0x134   : > { %v1078_v58 = vrot.slane %v1077_v44, 2 }
 0x136   : > { %v1079_v0 = vadd.f32 %v1078_v58, %v1077_v44 }
 0x137   : > { %v1532_v57 = vpop.eup %1531 }
 0x138   : > { %v1534_v59 = vpop.eup %1533  ;;  %v558_v61 = vmul.f32 %v1532_v57, %v1909_v53  ;;  %v1080_v22 = vrot.slane %v1079_v0, 1  ;;  %v1372_v57 = vld [vmem:[#allocation2 + $0x5d] ss:$0 sm:$0xff] }
 0x139   : > { %v1536_v62 = vpop.eup %1535  ;;  %v633_v63 = vmul.f32 %v1534_v59, %v1911_v55 }
 0x13a   : > { %v1538_v4 = vpop.eup %1537  ;;  %v585_v7 = vmul.f32 %v1332_v11, %v558_v61  ;;  %v708_v9 = vmul.f32 %v1536_v62, %v1915_v56  ;;  %v578_v10 = vmul.f32 %v1331_v1, %v558_v61  ;;  %v571_v14 = vmul.f32 %v1330_v3, %v558_v61  ;;  %v1362_v62 = vld [vmem:[#allocation2 + $0x4c] ss:$0 sm:$0xff]  ;;  %v1353_v3 = vld [vmem:[#allocation2 + $0x43] ss:$0 sm:$0xff] }
 0x13b   : > { %v660_v19 = vmul.f32 %v1340_v8, %v633_v63  ;;  %v783_v20 = vmul.f32 %v1538_v4, %v1919_v60  ;;  %v653_v53 = vmul.f32 %v1339_v13, %v633_v63  ;;  %v1540_v24 = vpop.eup %1539  ;;  %v646_v55 = vmul.f32 %v1338_v23, %v633_v63  ;;  %v1370_v23 = vld [vmem:[#allocation2 + $0x4d] ss:$0 sm:$0xff] }
 0x13c   : > { %v735_v27 = vmul.f32 %v1348_v25, %v708_v9  ;;  %v1081_v28 = vadd.f32 %v1080_v22, %v1079_v0  ;;  %v728_v56 = vmul.f32 %v1347_v29, %v708_v9  ;;  %v721_v35 = vmul.f32 %v1346_v36, %v708_v9  ;;  %v1542_v37 = vpop.eup %1541 }
 0x13d   : > { %v661_v26 = vadd.f32 %v660_v19, %v585_v7  ;;  %v654_v32 = vadd.f32 %v653_v53, %v578_v10  ;;  %v647_v34 = vadd.f32 %v646_v55, %v571_v14  ;;  %v810_v39 = vmul.f32 %v1356_v31, %v783_v20  ;;  %v1361_v10 = vld [vmem:[#allocation2 + $0x44] ss:$0 sm:$0xff]  ;;  %v1380_v53 = vld [vmem:[#allocation2 + $0x5e] ss:$0 sm:$0xff] }
 0x13e   : > { %v858_v60 = vmul.f32 %v1540_v24, %v1925_v2  ;;  %1545 = vrcp.f32 %v1081_v28  ;;  %v803_v17 = vmul.f32 %v1355_v15, %v783_v20  ;;  %v933_v45 = vmul.f32 %v1542_v37, %v1929_v12  ;;  %v1379_v28 = vld [vmem:[#allocation2 + $0x56] ss:$0 sm:$0xff] }
 0x13f   : > { %v736_v38 = vadd.f32 %v735_v27, %v661_v26  ;;  %v729_v40 = vadd.f32 %v728_v56, %v654_v32  ;;  %v722_v18 = vadd.f32 %v721_v35, %v647_v34  ;;  %v564_v46 = vmul.f32 %v1329_v41, %v558_v61  ;;  %v1544_v33 = vpop.eup %1543  ;;  %v1369_v26 = vld [vmem:[#allocation2 + $0x45] ss:$0 sm:$0xff]  ;;  %v1388_v32 = vld [vmem:[#allocation2 + $0x5f] ss:$0 sm:$0xff]  ;;  %v1378_v56 = vld [vmem:[#allocation2 + $0x4e] ss:$0 sm:$0xff] }
 0x140   : > { %v639_v47 = vmul.f32 %v1337_v42, %v633_v63  ;;  %v885_v48 = vmul.f32 %v1364_v43, %v858_v60  ;;  %v796_v51 = vmul.f32 %v1354_v21, %v783_v20  ;;  %v878_v58 = vmul.f32 %v1363_v52, %v858_v60  ;;  %v1371_v63 = vld [vmem:[#allocation2 + $0x55] ss:$0 sm:$0xff]  ;;  %v1385_v43 = vld [vmem:[#allocation2 + $0x47] ss:$0 sm:$0xff] }
 0x141   : > { %v811_v16 = vadd.f32 %v810_v39, %v736_v38  ;;  %v804_v49 = vadd.f32 %v803_v17, %v729_v40  ;;  %v714_v11 = vmul.f32 %v1345_v54, %v708_v9  ;;  %v960_v0 = vmul.f32 %v1372_v57, %v933_v45  ;;  %v1387_v39 = vld [vmem:[#allocation2 + $0x57] ss:$0 sm:$0xff] }
 0x142   : > { %v640_v2 = vadd.f32 %v639_v47, %v564_v46  ;;  %v797_v59 = vadd.f32 %v796_v51, %v722_v18  ;;  %v871_v1 = vmul.f32 %v1362_v62, %v858_v60  ;;  %v1008_v12 = vmul.f32 %v1544_v33, %v1933_v30  ;;  %v1386_v18 = vld [vmem:[#allocation2 + $0x4f] ss:$0 sm:$0xff]  ;;  %v1119_v33 = vpop.permute.xlu0 %1118 }
 0x143   : > { %v886_v44 = vadd.f32 %v885_v48, %v811_v16  ;;  %v879_v61 = vadd.f32 %v878_v58, %v804_v49  ;;  %v789_v7 = vmul.f32 %v1353_v3, %v783_v20  ;;  %v953_v8 = vmul.f32 %v1371_v63, %v933_v45  ;;  %v1113_v47 = vld [vmem:[%s2014_s3 + $0x8] sm:$0xff]  ;;  %v1124_v48 = vpop.permute.xlu1 %1123 }
 0x144   : > { %v715_v4 = vadd.f32 %v714_v11, %v640_v2  ;;  %v872_v14 = vadd.f32 %v871_v1, %v797_v59  ;;  %v864_v22 = vmul.f32 %v1361_v10, %v858_v60  ;;  %v1035_v24 = vmul.f32 %v1380_v53, %v1008_v12  ;;  %v1377_v60 = vld [vmem:[#allocation2 + $0x46] ss:$0 sm:$0xff] }
 0x145   : > { %v961_v13 = vadd.f32 %v960_v0, %v886_v44  ;;  %v954_v25 = vadd.f32 %v953_v8, %v879_v61  ;;  %v946_v9 = vmul.f32 %v1370_v23, %v933_v45  ;;  %v939_v30 = vmul.f32 %v1369_v26, %v933_v45 }
 0x146   : > { %v790_v19 = vadd.f32 %v789_v7, %v715_v4  ;;  %v1028_v20 = vmul.f32 %v1379_v28, %v1008_v12  ;;  %v1021_v37 = vmul.f32 %v1378_v56, %v1008_v12  ;;  %v1014_v17 = vmul.f32 %v1377_v60, %v1008_v12 }
 0x147   : > { %v1036_v29 = vadd.f32 %v1035_v24, %v961_v13  ;;  %v947_v31 = vadd.f32 %v946_v9, %v872_v14 }
 0x148   : > { %v865_v55 = vadd.f32 %v864_v22, %v790_v19  ;;  %v1029_v35 = vadd.f32 %v1028_v20, %v954_v25 }
 0x149   : > { %v1022_v16 = vadd.f32 %v1021_v37, %v947_v31 }
 0x14a   : > { %v940_v38 = vadd.f32 %v939_v30, %v865_v55 }
 0x14b   : > { %v1546_v27 = vpop.eup %1545 }
 0x14c   : > { %v1083_v36 = vmul.f32 %v1546_v27, %v1937_v50  ;;  %v1015_v50 = vadd.f32 %v1014_v17, %v940_v38 }
 0x14e   : > { %v1110_v34 = vmul.f32 %v1388_v32, %v1083_v36  ;;  %v1103_v15 = vmul.f32 %v1387_v39, %v1083_v36  ;;  %v1096_v42 = vmul.f32 %v1386_v18, %v1083_v36  ;;  %v1089_v21 = vmul.f32 %v1385_v43, %v1083_v36 }
 0x150   : > { %v1111_v40 = vadd.f32 %v1110_v34, %v1036_v29  ;;  %v1104_v41 = vadd.f32 %v1103_v15, %v1029_v35  ;;  %v1097_v45 = vadd.f32 %v1096_v42, %v1022_v16  ;;  %v1090_v46 = vadd.f32 %v1089_v21, %v1015_v50 }
 0x152   : > { %1440 = vmatprep.subr.mxu1 %v1111_v40 }
 0x153   : > { %1441 = vmatpush3.msra.mxu1 %v1111_v40 }
 0x154   : > { %1442 = vmatprep.subr.mxu1 %v1104_v41 }
 0x155   : > { %1443 = vmatpush3.msra.mxu1 %v1104_v41 }
 0x156   : > { %1444 = vmatprep.subr.mxu1 %v1097_v45 }
 0x157   : > { %1445 = vmatpush3.msra.mxu1 %v1097_v45 }
 0x158   : > { %1446 = vmatprep.subr.mxu1 %v1090_v46 }
 0x159   : > { %1447 = vmatpush3.msra.mxu1 %v1090_v46 }
 0x15a   : > { %1449 = vmatmul.mubr.msk.f32.vlgmr.msra.gmra.mxu1 %vm1126_vm1, %v1113_v47 }
 0x21a   : > { %v1450_v49 = vpop.f32.mrf.mxu1 }
 0x21b   : > { %v1205_v51 = vadd.f32 %v1450_v49, %v1124_v48 }
 0x21c   : > { %v1199_v52 = vpop.f32.mrf.mxu1 }
 0x21d   : > { %v1209_v2 = vadd.f32 %v1205_v51, %v1733_v5  ;;  %v1200_v54 = vadd.f32 %v1199_v52, %v1119_v33 }
 0x21f   : > { %1211 = vst.msk [vmem:[%s239_s10 + $0x8] sm:$0xff] %vm334_vm0, %v1209_v2  ;;  %v1208_v44 = vadd.f32 %v1200_v54, %v1735_v6 }
 0x221   : > { %1210 = vst.msk [vmem:[%s239_s10] sm:$0xff] %vm334_vm0, %v1208_v44 }
 0x222   : > { %1560 = shalt.err (!%p1557_p5)
}
 0x223   : > { %s1561_s27 = scalar_lea.hbm %s1959_s15, 256  ;;  %s1565_s8 = scalar_lea.hbm %s2016_s5, 512 }
 0x224   : > { %p1562_p6 = scmp.ne.s32.totalorder %s1959_s15, %s1561_s27  ;;  %p1566_p10 = scmp.lt.s32.totalorder %s1959_s15, %s2016_s5 }
 0x225   : > { %p1567_p11 = scmp.lt.s32.totalorder %s1565_s8, %s1561_s27 }
 0x226   : > { %p1563_p7 = pnand %p1562_p6, %p1699_p4 }
 0x227   : > { %p1568_p12 = por %p1567_p11, %p1566_p10 }
 0x228   : > { %p1564_p9 = pneg %p1563_p7 }
 0x22a   : > { %p1569_p13 = pnand %p1568_p12, %p1564_p9 }
 0x22c   : > { %1572 = shalt.err (!%p1569_p13)
}
 0x22d   : > { %s1627_s12 = smov 128   ;;  %s1628_s13 = smov 8  }
 0x22e   : > { %1455 = dma.vmem_to_hbm [thread:$0]  (%p1699_p4), %s1961_s11, 256, %s1959_s15, %s1966_s21, %s1627_s12, %s1627_s12, %s1628_s13  }
 0x22f PF: > { %p1461_p0 = scmp.ge.s32.totalorder %s1623_s23, 2  ;;  %s1242_s14 = sand.u32 1, %s1603_s18  }
 0x230   : > { %s1243_s16 = scalar_lea.sflag [#allocation4], %s1242_s14 }
 0x231   : > { %p1458_p1 = pnand %p1461_p0, %p1706_p8 }
 0x233   : > { %p1459_p2 = pneg %p1458_p1 }
 0x235   : > { %1598 = dma.done.wait (%p1459_p2), %s1243_s16, 256  }
 0x236   : > { %1600 = vsyncadd (%p1459_p2), %s1243_s16, 4294967040  ;;  %s18_s23 = sadd.s32 1, %s1623_s23   ;;  %s2019_s18 = smov %s1607_s19 }
 0x237   : > { %p15_p3 = scmp.ge.s32.totalorder %s18_s23, 4   ;;  %s2020_s19 = smov %s1611_s20 }
 0x238   : > { %s2021_s20 = smov %s1712_s6  ;;  %s2022_s21 = smov %s1619_s22 }
 0x239   : > { %s2023_s22 = smov %s2025_s26  ;;  %17 = sbr.rel (!%p15_p3) target bundleno = 4 (0x4), region = 75 }
 0x23e   :  { %1248 = vsyncpa [#allocation4], 1 }
 0x23f   :  { %1250 = vsyncpa [#allocation4 + $0x1], 1 }

</bundles_post_ra>
